<compile_context>
chip_gen: v5e
topology: v5e:2x2
jax: 0.10.0
libtpu: 0.0.40
codegen_flags: <defaults>
</compile_context>

<pallas_src>
import math

import jax
import jax.numpy as jnp
from jax import lax
from jax.experimental import pallas as pl
from jax.experimental.pallas import tpu as pltpu  # noqa: F401  (TPU backend)

# ----------------------------- config ---------------------------------------
VOCAB = 128        # vocab_size
CTX = 16           # context_length
EMB = 32           # embedding_dimension
NHEAD = 2          # num_heads  (head_dim = 16)
NLAYER = 2         # num_layers
EPS = 1e-5         # LayerNorm eps
HD = EMB // NHEAD
NEG_INF = -1e30    # finite mask value (avoids exp(-inf - -inf) NaN risk)

# plain Python floats -> jaxpr literals, never captured constants
INV_SCALE = 1.0 / math.sqrt(HD)
GELU_C = math.sqrt(2.0 / math.pi)

PER_LAYER = 13
LAYER_PARAM_ORDER = (
    "ln1_s", "ln1_b",
    "wq", "wk", "wv", "wo", "bo",
    "ln2_s", "ln2_b",
    "w1", "b1", "w2", "b2",
)


# --------------------------- in-kernel helpers -------------------------------
def _layernorm(x, scale, shift):
    # matches reference LayerNorm: mean/var over last dim, unbiased=False
    mean = jnp.mean(x, axis=-1, keepdims=True)
    var = jnp.mean((x - mean) ** 2, axis=-1, keepdims=True)
    return (x - mean) / jnp.sqrt(var + EPS) * scale + shift


def _gelu(x):
    # tanh-approx GELU exactly as in the reference GELU module
    return 0.5 * x * (1.0 + jnp.tanh(GELU_C * (x + 0.044715 * x ** 3)))


def _mm(a_f32, w_bf16):
    # bf16 MXU matmul with f32 accumulation
    return jnp.dot(a_f32.astype(jnp.bfloat16), w_bf16,
                   preferred_element_type=jnp.float32)


# ------------------------------ fused kernel ---------------------------------
def _make_kernel(B, T):
    BT = B * T

    def kernel(idx_ref, tok_ref, pos_ref, *rest):
        # rest = NLAYER*PER_LAYER layer refs + [ln_f_s, ln_f_b, w_out] + [o_ref]
        o_ref = rest[-1]
        lnf_s = rest[-4][...]
        lnf_b = rest[-3][...]
        w_out = rest[-2][...]
        layer_refs = rest[:NLAYER * PER_LAYER]

        # ---- token embedding gather as one-hot @ table (MXU), + pos add ----
        ids = idx_ref[...]                                          # (BT, 1) i32
        onehot = (lax.broadcasted_iota(jnp.int32, (BT, VOCAB), 1) == ids)
        x = jnp.dot(onehot.astype(jnp.float32), tok_ref[...],
                    preferred_element_type=jnp.float32) + pos_ref[...]   # (BT, D)
        # drop_emb: identity (rate 0.0 / eval mode)

        # ---- causal mask, built once for the whole model ----
        qi = lax.broadcasted_iota(jnp.int32, (T, T), 0)
        ki = lax.broadcasted_iota(jnp.int32, (T, T), 1)
        causal = ki > qi                     # True above diagonal -> masked

        for l in range(NLAYER):
            (ln1_s_r, ln1_b_r, wq_r, wk_r, wv_r, wo_r, bo_r,
             ln2_s_r, ln2_b_r, w1_r, b1_r, w2_r, b2_r) = \
                layer_refs[l * PER_LAYER:(l + 1) * PER_LAYER]

            # -------- attention sub-block (pre-LN, causal MHA, residual) ----
            h = _layernorm(x, ln1_s_r[...], ln1_b_r[...])           # f32 (BT, D)
            q = _mm(h, wq_r[...]) * INV_SCALE                       # qkv_bias=False
            k = _mm(h, wk_r[...])
            v = _mm(h, wv_r[...])
            q3 = q.reshape(B, T, EMB)
            k3 = k.reshape(B, T, EMB)
            v3 = v.reshape(B, T, EMB)

            ctx_heads = []
            for hh in range(NHEAD):          # static, tiny head count; B batched
                sl = slice(hh * HD, (hh + 1) * HD)
                qh = q3[:, :, sl].astype(jnp.bfloat16)
                kh = k3[:, :, sl].astype(jnp.bfloat16)
                vh = v3[:, :, sl].astype(jnp.bfloat16)
                s = jnp.einsum('bqd,bkd->bqk', qh, kh,
                               preferred_element_type=jnp.float32)  # (B,T,T)
                s = jnp.where(causal, NEG_INF, s)
                s = s - jnp.max(s, axis=-1, keepdims=True)
                e = jnp.exp(s)
                a = e / jnp.sum(e, axis=-1, keepdims=True)          # f32 softmax
                ctx_heads.append(
                    jnp.einsum('bqk,bkd->bqd', a.astype(jnp.bfloat16), vh,
                               preferred_element_type=jnp.float32))
            ctx = jnp.concatenate(ctx_heads, axis=-1).reshape(BT, EMB)
            attn_out = _mm(ctx, wo_r[...]) + bo_r[...]
            x = x + attn_out                 # drop_shortcut = identity

            # -------- feed-forward sub-block (pre-LN, GELU MLP, residual) ---
            h = _layernorm(x, ln2_s_r[...], ln2_b_r[...])
            h = _mm(h, w1_r[...]) + b1_r[...]
            h = _gelu(h)
            h = _mm(h, w2_r[...]) + b2_r[...]
            x = x + h                        # drop_shortcut = identity

        # ---- final norm + vocab head (lane-dense V=128 output store) ----
        h = _layernorm(x, lnf_s, lnf_b)
        logits = jnp.dot(h.astype(jnp.bfloat16), w_out,
                         preferred_element_type=jnp.float32)        # (BT, V)
        o_ref[...] = logits.reshape(B, T, VOCAB)

    return kernel


# ------------------------------ wrapper ---------------------------------------
def gpt_forward(in_idx, params):
    """GPTModel.forward: token ids (B, T) int32 -> logits (B, T, VOCAB) f32."""
    B, T = in_idx.shape
    pos_bt = jnp.tile(params["pos_emb"][:T], (B, 1))        # (B*T, D) f32
    idx2d = in_idx.reshape(B * T, 1).astype(jnp.int32)

    flat = [idx2d, params["tok_emb"], pos_bt]
    for layer in params["layers"]:
        flat += [layer[name] for name in LAYER_PARAM_ORDER]
    flat += [params["ln_f_s"], params["ln_f_b"], params["w_out"]]

    return pl.pallas_call(
        _make_kernel(B, T),
        out_shape=jax.ShapeDtypeStruct((B, T, VOCAB), jnp.float32),
        # no grid / BlockSpecs: single fused invocation, every operand fully
        # VMEM-resident (total parameter footprint ~100 KB, fine on v5e/v6e/v7x)
    )(*flat)


# --------------------------- parameter init ----------------------------------
def init_params(key):
    std = 0.02
    keys = jax.random.split(key, 3 + NLAYER)

    def w(k, shape):  # matmul weights stored bf16 (MXU-native input dtype)
        return (jax.random.normal(k, shape, jnp.float32) * std).astype(jnp.bfloat16)

    params = {
        "tok_emb": jax.random.normal(keys[0], (VOCAB, EMB), jnp.float32) * std,
        "pos_emb": jax.random.normal(keys[1], (CTX, EMB), jnp.float32) * std,
        "ln_f_s": jnp.ones((1, EMB), jnp.float32),
        "ln_f_b": jnp.zeros((1, EMB), jnp.float32),
        "w_out": w(keys[2], (EMB, VOCAB)),
        "layers": [],
    }
    for i in range(NLAYER):
        lk = jax.random.split(keys[3 + i], 6)
        layer = {
            "ln1_s": jnp.ones((1, EMB), jnp.float32),
            "ln1_b": jnp.zeros((1, EMB), jnp.float32),
            "wq": w(lk[0], (EMB, EMB)),      # qkv_bias=False -> no bq/bk/bv
            "wk": w(lk[1], (EMB, EMB)),
            "wv": w(lk[2], (EMB, EMB)),
            "wo": w(lk[3], (EMB, EMB)),
            "bo": jnp.zeros((1, EMB), jnp.float32),
            "ln2_s": jnp.ones((1, EMB), jnp.float32),
            "ln2_b": jnp.zeros((1, EMB), jnp.float32),
            "w1": w(lk[4], (EMB, 4 * EMB)),
            "b1": jnp.zeros((1, 4 * EMB), jnp.float32),
            "w2": w(lk[5], (4 * EMB, EMB)),
            "b2": jnp.zeros((1, EMB), jnp.float32),
        }
        params["layers"].append(layer)
    return params


# ------------------------------- main -----------------------------------------
if __name__ == "__main__":
    root = jax.random.PRNGKey(0)
    pkey, ikey = jax.random.split(root)
    params = init_params(pkey)

    B, T = 2, 8
    in_idx = jax.random.randint(ikey, (B, T), 0, VOCAB, dtype=jnp.int32)

    logits = jax.jit(gpt_forward)(in_idx, params)
    logits = jax.block_until_ready(logits)

    assert logits.shape == (B, T, VOCAB) and logits.dtype == jnp.float32
    assert bool(jnp.all(jnp.isfinite(logits)))
    print("KERNEL_OK")
</pallas_src>

<mosaic_0001>
module attributes {stable_mosaic.version = 11 : i64} {
  func.func @kernel(%arg0: memref<16x1xi32, #tpu.memory_space<vmem>>, %arg1: memref<128x32xf32, #tpu.memory_space<vmem>>, %arg2: memref<16x32xf32, #tpu.memory_space<vmem>>, %arg3: memref<1x32xf32, #tpu.memory_space<vmem>>, %arg4: memref<1x32xf32, #tpu.memory_space<vmem>>, %arg5: memref<32x32xbf16, #tpu.memory_space<vmem>>, %arg6: memref<32x32xbf16, #tpu.memory_space<vmem>>, %arg7: memref<32x32xbf16, #tpu.memory_space<vmem>>, %arg8: memref<32x32xbf16, #tpu.memory_space<vmem>>, %arg9: memref<1x32xf32, #tpu.memory_space<vmem>>, %arg10: memref<1x32xf32, #tpu.memory_space<vmem>>, %arg11: memref<1x32xf32, #tpu.memory_space<vmem>>, %arg12: memref<32x128xbf16, #tpu.memory_space<vmem>>, %arg13: memref<1x128xf32, #tpu.memory_space<vmem>>, %arg14: memref<128x32xbf16, #tpu.memory_space<vmem>>, %arg15: memref<1x32xf32, #tpu.memory_space<vmem>>, %arg16: memref<1x32xf32, #tpu.memory_space<vmem>>, %arg17: memref<1x32xf32, #tpu.memory_space<vmem>>, %arg18: memref<32x32xbf16, #tpu.memory_space<vmem>>, %arg19: memref<32x32xbf16, #tpu.memory_space<vmem>>, %arg20: memref<32x32xbf16, #tpu.memory_space<vmem>>, %arg21: memref<32x32xbf16, #tpu.memory_space<vmem>>, %arg22: memref<1x32xf32, #tpu.memory_space<vmem>>, %arg23: memref<1x32xf32, #tpu.memory_space<vmem>>, %arg24: memref<1x32xf32, #tpu.memory_space<vmem>>, %arg25: memref<32x128xbf16, #tpu.memory_space<vmem>>, %arg26: memref<1x128xf32, #tpu.memory_space<vmem>>, %arg27: memref<128x32xbf16, #tpu.memory_space<vmem>>, %arg28: memref<1x32xf32, #tpu.memory_space<vmem>>, %arg29: memref<1x32xf32, #tpu.memory_space<vmem>>, %arg30: memref<1x32xf32, #tpu.memory_space<vmem>>, %arg31: memref<32x128xbf16, #tpu.memory_space<vmem>>, %arg32: memref<2x8x128xf32, #tpu.memory_space<vmem>>) attributes {dimension_semantics = [], scalar_prefetch = 0 : i64, scratch_operands = 0 : i64, tpu.core_type = #tpu.core_type<tc>} {
    %c0 = arith.constant 0 : index
    %c0_0 = arith.constant 0 : index
    %0 = vector.load %arg29[%c0, %c0_0] : memref<1x32xf32, #tpu.memory_space<vmem>>, vector<1x32xf32>
    %c0_1 = arith.constant 0 : index
    %c0_2 = arith.constant 0 : index
    %1 = vector.load %arg30[%c0_1, %c0_2] : memref<1x32xf32, #tpu.memory_space<vmem>>, vector<1x32xf32>
    %c0_3 = arith.constant 0 : index
    %c0_4 = arith.constant 0 : index
    %2 = vector.load %arg31[%c0_3, %c0_4] : memref<32x128xbf16, #tpu.memory_space<vmem>>, vector<32x128xbf16>
    %c0_5 = arith.constant 0 : index
    %c0_6 = arith.constant 0 : index
    %3 = vector.load %arg0[%c0_5, %c0_6] : memref<16x1xi32, #tpu.memory_space<vmem>>, vector<16x1xi32>
    %4 = tpu.iota {dimensions = array<i32: 1>} : vector<16x128xi32>
    %5 = vector.broadcast %3 : vector<16x1xi32> to vector<16x128xi32>
    %6 = arith.cmpi eq, %4, %5 : vector<16x128xi32>
    %7 = arith.extui %6 : vector<16x128xi1> to vector<16x128xi32>
    %8 = arith.sitofp %7 : vector<16x128xi32> to vector<16x128xf32>
    %c0_7 = arith.constant 0 : index
    %c0_8 = arith.constant 0 : index
    %9 = vector.load %arg1[%c0_7, %c0_8] : memref<128x32xf32, #tpu.memory_space<vmem>>, vector<128x32xf32>
    %cst = arith.constant dense<0.000000e+00> : vector<16x32xf32>
    %10 = tpu.matmul %8, %9, %cst {dimension_numbers = #tpu.dot_dimension_numbers<[1], [0], [0], [1], [0, 0, 1, 1], [], []>} : vector<16x128xf32>, vector<128x32xf32>, vector<16x32xf32> -> vector<16x32xf32>
    %c0_9 = arith.constant 0 : index
    %c0_10 = arith.constant 0 : index
    %11 = vector.load %arg2[%c0_9, %c0_10] : memref<16x32xf32, #tpu.memory_space<vmem>>, vector<16x32xf32>
    %12 = arith.addf %10, %11 : vector<16x32xf32>
    %13 = tpu.iota {dimensions = array<i32: 0>} : vector<8x8xi32>
    %14 = tpu.iota {dimensions = array<i32: 1>} : vector<8x8xi32>
    %15 = arith.cmpi sgt, %14, %13 : vector<8x8xi32>
    %c0_11 = arith.constant 0 : index
    %c0_12 = arith.constant 0 : index
    %16 = vector.load %arg3[%c0_11, %c0_12] : memref<1x32xf32, #tpu.memory_space<vmem>>, vector<1x32xf32>
    %c0_13 = arith.constant 0 : index
    %c0_14 = arith.constant 0 : index
    %17 = vector.load %arg4[%c0_13, %c0_14] : memref<1x32xf32, #tpu.memory_space<vmem>>, vector<1x32xf32>
    %cst_15 = arith.constant dense<0.000000e+00> : vector<16xf32>
    %18 = vector.multi_reduction <add>, %12, %cst_15 [1] : vector<16x32xf32> to vector<16xf32>
    %19 = vector.shape_cast %18 : vector<16xf32> to vector<16x1xf32>
    %cst_16 = arith.constant 3.200000e+01 : f32
    %20 = vector.broadcast %cst_16 : f32 to vector<16x1xf32>
    %21 = arith.divf %19, %20 : vector<16x1xf32>
    %22 = vector.broadcast %21 : vector<16x1xf32> to vector<16x32xf32>
    %23 = arith.subf %12, %22 : vector<16x32xf32>
    %24 = arith.mulf %23, %23 : vector<16x32xf32>
    %cst_17 = arith.constant dense<0.000000e+00> : vector<16xf32>
    %25 = vector.multi_reduction <add>, %24, %cst_17 [1] : vector<16x32xf32> to vector<16xf32>
    %26 = vector.shape_cast %25 : vector<16xf32> to vector<16x1xf32>
    %cst_18 = arith.constant 3.200000e+01 : f32
    %27 = vector.broadcast %cst_18 : f32 to vector<16x1xf32>
    %28 = arith.divf %26, %27 : vector<16x1xf32>
    %29 = vector.broadcast %21 : vector<16x1xf32> to vector<16x32xf32>
    %30 = arith.subf %12, %29 : vector<16x32xf32>
    %cst_19 = arith.constant 9.99999974E-6 : f32
    %31 = vector.broadcast %cst_19 : f32 to vector<16x1xf32>
    %32 = arith.addf %28, %31 : vector<16x1xf32>
    %33 = math.sqrt %32 : vector<16x1xf32>
    %34 = vector.broadcast %33 : vector<16x1xf32> to vector<16x32xf32>
    %35 = arith.divf %30, %34 : vector<16x32xf32>
    %36 = vector.broadcast %16 : vector<1x32xf32> to vector<16x32xf32>
    %37 = arith.mulf %35, %36 : vector<16x32xf32>
    %38 = vector.broadcast %17 : vector<1x32xf32> to vector<16x32xf32>
    %39 = arith.addf %37, %38 : vector<16x32xf32>
    %c0_20 = arith.constant 0 : index
    %c0_21 = arith.constant 0 : index
    %40 = vector.load %arg5[%c0_20, %c0_21] : memref<32x32xbf16, #tpu.memory_space<vmem>>, vector<32x32xbf16>
    %41 = arith.truncf %39 : vector<16x32xf32> to vector<16x32xbf16>
    %cst_22 = arith.constant dense<0.000000e+00> : vector<16x32xf32>
    %42 = tpu.matmul %41, %40, %cst_22 {dimension_numbers = #tpu.dot_dimension_numbers<[1], [0], [0], [1], [0, 0, 1, 1], [], []>} : vector<16x32xbf16>, vector<32x32xbf16>, vector<16x32xf32> -> vector<16x32xf32>
    %cst_23 = arith.constant 2.500000e-01 : f32
    %43 = vector.broadcast %cst_23 : f32 to vector<16x32xf32>
    %44 = arith.mulf %42, %43 : vector<16x32xf32>
    %c0_24 = arith.constant 0 : index
    %c0_25 = arith.constant 0 : index
    %45 = vector.load %arg6[%c0_24, %c0_25] : memref<32x32xbf16, #tpu.memory_space<vmem>>, vector<32x32xbf16>
    %46 = arith.truncf %39 : vector<16x32xf32> to vector<16x32xbf16>
    %cst_26 = arith.constant dense<0.000000e+00> : vector<16x32xf32>
    %47 = tpu.matmul %46, %45, %cst_26 {dimension_numbers = #tpu.dot_dimension_numbers<[1], [0], [0], [1], [0, 0, 1, 1], [], []>} : vector<16x32xbf16>, vector<32x32xbf16>, vector<16x32xf32> -> vector<16x32xf32>
    %c0_27 = arith.constant 0 : index
    %c0_28 = arith.constant 0 : index
    %48 = vector.load %arg7[%c0_27, %c0_28] : memref<32x32xbf16, #tpu.memory_space<vmem>>, vector<32x32xbf16>
    %49 = arith.truncf %39 : vector<16x32xf32> to vector<16x32xbf16>
    %cst_29 = arith.constant dense<0.000000e+00> : vector<16x32xf32>
    %50 = tpu.matmul %49, %48, %cst_29 {dimension_numbers = #tpu.dot_dimension_numbers<[1], [0], [0], [1], [0, 0, 1, 1], [], []>} : vector<16x32xbf16>, vector<32x32xbf16>, vector<16x32xf32> -> vector<16x32xf32>
    %51 = vector.shape_cast %44 : vector<16x32xf32> to vector<2x8x32xf32>
    %52 = vector.shape_cast %47 : vector<16x32xf32> to vector<2x8x32xf32>
    %53 = vector.shape_cast %50 : vector<16x32xf32> to vector<2x8x32xf32>
    %54 = vector.extract_strided_slice %51 {offsets = [0, 0, 0], sizes = [2, 8, 16], strides = [1, 1, 1]} : vector<2x8x32xf32> to vector<2x8x16xf32>
    %55 = arith.truncf %54 : vector<2x8x16xf32> to vector<2x8x16xbf16>
    %56 = vector.extract_strided_slice %52 {offsets = [0, 0, 0], sizes = [2, 8, 16], strides = [1, 1, 1]} : vector<2x8x32xf32> to vector<2x8x16xf32>
    %57 = arith.truncf %56 : vector<2x8x16xf32> to vector<2x8x16xbf16>
    %58 = vector.extract_strided_slice %53 {offsets = [0, 0, 0], sizes = [2, 8, 16], strides = [1, 1, 1]} : vector<2x8x32xf32> to vector<2x8x16xf32>
    %59 = arith.truncf %58 : vector<2x8x16xf32> to vector<2x8x16xbf16>
    "tpu.trace_start"() <{level = 10 : i32, message = "bqd,bkd->bqk"}> : () -> ()
    %cst_30 = arith.constant dense<0.000000e+00> : vector<2x8x8xf32>
    %60 = tpu.matmul %55, %57, %cst_30 {dimension_numbers = #tpu.dot_dimension_numbers<[2], [2], [1], [1], [0, 0, 0, 1, 1, 1], [0], [0]>} : vector<2x8x16xbf16>, vector<2x8x16xbf16>, vector<2x8x8xf32> -> vector<2x8x8xf32>
    %cst_31 = arith.constant -1.000000e+30 : f32
    "tpu.trace_stop"() : () -> ()
    %61 = vector.shape_cast %15 : vector<8x8xi1> to vector<1x8x8xi1>
    %62 = vector.broadcast %61 : vector<1x8x8xi1> to vector<2x8x8xi1>
    %63 = vector.broadcast %cst_31 : f32 to vector<2x8x8xf32>
    %64 = arith.select %62, %63, %60 : vector<2x8x8xi1>, vector<2x8x8xf32>
    %cst_32 = arith.constant dense<0xFF800000> : vector<2x8xf32>
    %65 = vector.multi_reduction <maximumf>, %64, %cst_32 [2] : vector<2x8x8xf32> to vector<2x8xf32>
    %66 = vector.shape_cast %65 : vector<2x8xf32> to vector<2x8x1xf32>
    %67 = vector.broadcast %66 : vector<2x8x1xf32> to vector<2x8x8xf32>
    %68 = arith.subf %64, %67 : vector<2x8x8xf32>
    %69 = math.exp %68 : vector<2x8x8xf32>
    %cst_33 = arith.constant dense<0.000000e+00> : vector<2x8xf32>
    %70 = vector.multi_reduction <add>, %69, %cst_33 [2] : vector<2x8x8xf32> to vector<2x8xf32>
    %71 = vector.shape_cast %70 : vector<2x8xf32> to vector<2x8x1xf32>
    %72 = vector.broadcast %71 : vector<2x8x1xf32> to vector<2x8x8xf32>
    %73 = arith.divf %69, %72 : vector<2x8x8xf32>
    %74 = arith.truncf %73 : vector<2x8x8xf32> to vector<2x8x8xbf16>
    "tpu.trace_start"() <{level = 10 : i32, message = "bqk,bkd->bqd"}> : () -> ()
    %cst_34 = arith.constant dense<0.000000e+00> : vector<2x8x16xf32>
    %75 = tpu.matmul %74, %59, %cst_34 {dimension_numbers = #tpu.dot_dimension_numbers<[2], [1], [1], [2], [0, 0, 0, 1, 1, 2], [0], [0]>} : vector<2x8x8xbf16>, vector<2x8x16xbf16>, vector<2x8x16xf32> -> vector<2x8x16xf32>
    "tpu.trace_stop"() : () -> ()
    %76 = vector.extract_strided_slice %51 {offsets = [0, 0, 16], sizes = [2, 8, 16], strides = [1, 1, 1]} : vector<2x8x32xf32> to vector<2x8x16xf32>
    %77 = arith.truncf %76 : vector<2x8x16xf32> to vector<2x8x16xbf16>
    %78 = vector.extract_strided_slice %52 {offsets = [0, 0, 16], sizes = [2, 8, 16], strides = [1, 1, 1]} : vector<2x8x32xf32> to vector<2x8x16xf32>
    %79 = arith.truncf %78 : vector<2x8x16xf32> to vector<2x8x16xbf16>
    %80 = vector.extract_strided_slice %53 {offsets = [0, 0, 16], sizes = [2, 8, 16], strides = [1, 1, 1]} : vector<2x8x32xf32> to vector<2x8x16xf32>
    %81 = arith.truncf %80 : vector<2x8x16xf32> to vector<2x8x16xbf16>
    "tpu.trace_start"() <{level = 10 : i32, message = "bqd,bkd->bqk"}> : () -> ()
    %cst_35 = arith.constant dense<0.000000e+00> : vector<2x8x8xf32>
    %82 = tpu.matmul %77, %79, %cst_35 {dimension_numbers = #tpu.dot_dimension_numbers<[2], [2], [1], [1], [0, 0, 0, 1, 1, 1], [0], [0]>} : vector<2x8x16xbf16>, vector<2x8x16xbf16>, vector<2x8x8xf32> -> vector<2x8x8xf32>
    %cst_36 = arith.constant -1.000000e+30 : f32
    "tpu.trace_stop"() : () -> ()
    %83 = vector.shape_cast %15 : vector<8x8xi1> to vector<1x8x8xi1>
    %84 = vector.broadcast %83 : vector<1x8x8xi1> to vector<2x8x8xi1>
    %85 = vector.broadcast %cst_36 : f32 to vector<2x8x8xf32>
    %86 = arith.select %84, %85, %82 : vector<2x8x8xi1>, vector<2x8x8xf32>
    %cst_37 = arith.constant dense<0xFF800000> : vector<2x8xf32>
    %87 = vector.multi_reduction <maximumf>, %86, %cst_37 [2] : vector<2x8x8xf32> to vector<2x8xf32>
    %88 = vector.shape_cast %87 : vector<2x8xf32> to vector<2x8x1xf32>
    %89 = vector.broadcast %88 : vector<2x8x1xf32> to vector<2x8x8xf32>
    %90 = arith.subf %86, %89 : vector<2x8x8xf32>
    %91 = math.exp %90 : vector<2x8x8xf32>
    %cst_38 = arith.constant dense<0.000000e+00> : vector<2x8xf32>
    %92 = vector.multi_reduction <add>, %91, %cst_38 [2] : vector<2x8x8xf32> to vector<2x8xf32>
    %93 = vector.shape_cast %92 : vector<2x8xf32> to vector<2x8x1xf32>
    %94 = vector.broadcast %93 : vector<2x8x1xf32> to vector<2x8x8xf32>
    %95 = arith.divf %91, %94 : vector<2x8x8xf32>
    %96 = arith.truncf %95 : vector<2x8x8xf32> to vector<2x8x8xbf16>
    "tpu.trace_start"() <{level = 10 : i32, message = "bqk,bkd->bqd"}> : () -> ()
    %cst_39 = arith.constant dense<0.000000e+00> : vector<2x8x16xf32>
    %97 = tpu.matmul %96, %81, %cst_39 {dimension_numbers = #tpu.dot_dimension_numbers<[2], [1], [1], [2], [0, 0, 0, 1, 1, 2], [0], [0]>} : vector<2x8x8xbf16>, vector<2x8x16xbf16>, vector<2x8x16xf32> -> vector<2x8x16xf32>
    "tpu.trace_stop"() : () -> ()
    %98 = tpu.concatenate %75, %97 in 2 : vector<2x8x16xf32>, vector<2x8x16xf32> -> vector<2x8x32xf32>
    %99 = vector.shape_cast %98 : vector<2x8x32xf32> to vector<16x32xf32>
    %c0_40 = arith.constant 0 : index
    %c0_41 = arith.constant 0 : index
    %100 = vector.load %arg8[%c0_40, %c0_41] : memref<32x32xbf16, #tpu.memory_space<vmem>>, vector<32x32xbf16>
    %101 = arith.truncf %99 : vector<16x32xf32> to vector<16x32xbf16>
    %cst_42 = arith.constant dense<0.000000e+00> : vector<16x32xf32>
    %102 = tpu.matmul %101, %100, %cst_42 {dimension_numbers = #tpu.dot_dimension_numbers<[1], [0], [0], [1], [0, 0, 1, 1], [], []>} : vector<16x32xbf16>, vector<32x32xbf16>, vector<16x32xf32> -> vector<16x32xf32>
    %c0_43 = arith.constant 0 : index
    %c0_44 = arith.constant 0 : index
    %103 = vector.load %arg9[%c0_43, %c0_44] : memref<1x32xf32, #tpu.memory_space<vmem>>, vector<1x32xf32>
    %104 = vector.broadcast %103 : vector<1x32xf32> to vector<16x32xf32>
    %105 = arith.addf %102, %104 : vector<16x32xf32>
    %106 = arith.addf %12, %105 : vector<16x32xf32>
    %c0_45 = arith.constant 0 : index
    %c0_46 = arith.constant 0 : index
    %107 = vector.load %arg10[%c0_45, %c0_46] : memref<1x32xf32, #tpu.memory_space<vmem>>, vector<1x32xf32>
    %c0_47 = arith.constant 0 : index
    %c0_48 = arith.constant 0 : index
    %108 = vector.load %arg11[%c0_47, %c0_48] : memref<1x32xf32, #tpu.memory_space<vmem>>, vector<1x32xf32>
    %cst_49 = arith.constant dense<0.000000e+00> : vector<16xf32>
    %109 = vector.multi_reduction <add>, %106, %cst_49 [1] : vector<16x32xf32> to vector<16xf32>
    %110 = vector.shape_cast %109 : vector<16xf32> to vector<16x1xf32>
    %cst_50 = arith.constant 3.200000e+01 : f32
    %111 = vector.broadcast %cst_50 : f32 to vector<16x1xf32>
    %112 = arith.divf %110, %111 : vector<16x1xf32>
    %113 = vector.broadcast %112 : vector<16x1xf32> to vector<16x32xf32>
    %114 = arith.subf %106, %113 : vector<16x32xf32>
    %115 = arith.mulf %114, %114 : vector<16x32xf32>
    %cst_51 = arith.constant dense<0.000000e+00> : vector<16xf32>
    %116 = vector.multi_reduction <add>, %115, %cst_51 [1] : vector<16x32xf32> to vector<16xf32>
    %117 = vector.shape_cast %116 : vector<16xf32> to vector<16x1xf32>
    %cst_52 = arith.constant 3.200000e+01 : f32
    %118 = vector.broadcast %cst_52 : f32 to vector<16x1xf32>
    %119 = arith.divf %117, %118 : vector<16x1xf32>
    %120 = vector.broadcast %112 : vector<16x1xf32> to vector<16x32xf32>
    %121 = arith.subf %106, %120 : vector<16x32xf32>
    %cst_53 = arith.constant 9.99999974E-6 : f32
    %122 = vector.broadcast %cst_53 : f32 to vector<16x1xf32>
    %123 = arith.addf %119, %122 : vector<16x1xf32>
    %124 = math.sqrt %123 : vector<16x1xf32>
    %125 = vector.broadcast %124 : vector<16x1xf32> to vector<16x32xf32>
    %126 = arith.divf %121, %125 : vector<16x32xf32>
    %127 = vector.broadcast %107 : vector<1x32xf32> to vector<16x32xf32>
    %128 = arith.mulf %126, %127 : vector<16x32xf32>
    %129 = vector.broadcast %108 : vector<1x32xf32> to vector<16x32xf32>
    %130 = arith.addf %128, %129 : vector<16x32xf32>
    %c0_54 = arith.constant 0 : index
    %c0_55 = arith.constant 0 : index
    %131 = vector.load %arg12[%c0_54, %c0_55] : memref<32x128xbf16, #tpu.memory_space<vmem>>, vector<32x128xbf16>
    %132 = arith.truncf %130 : vector<16x32xf32> to vector<16x32xbf16>
    %cst_56 = arith.constant dense<0.000000e+00> : vector<16x128xf32>
    %133 = tpu.matmul %132, %131, %cst_56 {dimension_numbers = #tpu.dot_dimension_numbers<[1], [0], [0], [1], [0, 0, 1, 1], [], []>} : vector<16x32xbf16>, vector<32x128xbf16>, vector<16x128xf32> -> vector<16x128xf32>
    %c0_57 = arith.constant 0 : index
    %c0_58 = arith.constant 0 : index
    %134 = vector.load %arg13[%c0_57, %c0_58] : memref<1x128xf32, #tpu.memory_space<vmem>>, vector<1x128xf32>
    %135 = vector.broadcast %134 : vector<1x128xf32> to vector<16x128xf32>
    %136 = arith.addf %133, %135 : vector<16x128xf32>
    %cst_59 = arith.constant 5.000000e-01 : f32
    %137 = vector.broadcast %cst_59 : f32 to vector<16x128xf32>
    %138 = arith.mulf %137, %136 : vector<16x128xf32>
    %139 = arith.mulf %136, %136 : vector<16x128xf32>
    %140 = arith.mulf %136, %139 : vector<16x128xf32>
    %cst_60 = arith.constant 4.471500e-02 : f32
    %141 = vector.broadcast %cst_60 : f32 to vector<16x128xf32>
    %142 = arith.mulf %141, %140 : vector<16x128xf32>
    %143 = arith.addf %136, %142 : vector<16x128xf32>
    %cst_61 = arith.constant 0.797884583 : f32
    %144 = vector.broadcast %cst_61 : f32 to vector<16x128xf32>
    %145 = arith.mulf %144, %143 : vector<16x128xf32>
    %146 = math.tanh %145 : vector<16x128xf32>
    %cst_62 = arith.constant 1.000000e+00 : f32
    %147 = vector.broadcast %cst_62 : f32 to vector<16x128xf32>
    %148 = arith.addf %147, %146 : vector<16x128xf32>
    %149 = arith.mulf %138, %148 : vector<16x128xf32>
    %c0_63 = arith.constant 0 : index
    %c0_64 = arith.constant 0 : index
    %150 = vector.load %arg14[%c0_63, %c0_64] : memref<128x32xbf16, #tpu.memory_space<vmem>>, vector<128x32xbf16>
    %151 = arith.truncf %149 : vector<16x128xf32> to vector<16x128xbf16>
    %cst_65 = arith.constant dense<0.000000e+00> : vector<16x32xf32>
    %152 = tpu.matmul %151, %150, %cst_65 {dimension_numbers = #tpu.dot_dimension_numbers<[1], [0], [0], [1], [0, 0, 1, 1], [], []>} : vector<16x128xbf16>, vector<128x32xbf16>, vector<16x32xf32> -> vector<16x32xf32>
    %c0_66 = arith.constant 0 : index
    %c0_67 = arith.constant 0 : index
    %153 = vector.load %arg15[%c0_66, %c0_67] : memref<1x32xf32, #tpu.memory_space<vmem>>, vector<1x32xf32>
    %154 = vector.broadcast %153 : vector<1x32xf32> to vector<16x32xf32>
    %155 = arith.addf %152, %154 : vector<16x32xf32>
    %156 = arith.addf %106, %155 : vector<16x32xf32>
    %c0_68 = arith.constant 0 : index
    %c0_69 = arith.constant 0 : index
    %157 = vector.load %arg16[%c0_68, %c0_69] : memref<1x32xf32, #tpu.memory_space<vmem>>, vector<1x32xf32>
    %c0_70 = arith.constant 0 : index
    %c0_71 = arith.constant 0 : index
    %158 = vector.load %arg17[%c0_70, %c0_71] : memref<1x32xf32, #tpu.memory_space<vmem>>, vector<1x32xf32>
    %cst_72 = arith.constant dense<0.000000e+00> : vector<16xf32>
    %159 = vector.multi_reduction <add>, %156, %cst_72 [1] : vector<16x32xf32> to vector<16xf32>
    %160 = vector.shape_cast %159 : vector<16xf32> to vector<16x1xf32>
    %cst_73 = arith.constant 3.200000e+01 : f32
    %161 = vector.broadcast %cst_73 : f32 to vector<16x1xf32>
    %162 = arith.divf %160, %161 : vector<16x1xf32>
    %163 = vector.broadcast %162 : vector<16x1xf32> to vector<16x32xf32>
    %164 = arith.subf %156, %163 : vector<16x32xf32>
    %165 = arith.mulf %164, %164 : vector<16x32xf32>
    %cst_74 = arith.constant dense<0.000000e+00> : vector<16xf32>
    %166 = vector.multi_reduction <add>, %165, %cst_74 [1] : vector<16x32xf32> to vector<16xf32>
    %167 = vector.shape_cast %166 : vector<16xf32> to vector<16x1xf32>
    %cst_75 = arith.constant 3.200000e+01 : f32
    %168 = vector.broadcast %cst_75 : f32 to vector<16x1xf32>
    %169 = arith.divf %167, %168 : vector<16x1xf32>
    %170 = vector.broadcast %162 : vector<16x1xf32> to vector<16x32xf32>
    %171 = arith.subf %156, %170 : vector<16x32xf32>
    %cst_76 = arith.constant 9.99999974E-6 : f32
    %172 = vector.broadcast %cst_76 : f32 to vector<16x1xf32>
    %173 = arith.addf %169, %172 : vector<16x1xf32>
    %174 = math.sqrt %173 : vector<16x1xf32>
    %175 = vector.broadcast %174 : vector<16x1xf32> to vector<16x32xf32>
    %176 = arith.divf %171, %175 : vector<16x32xf32>
    %177 = vector.broadcast %157 : vector<1x32xf32> to vector<16x32xf32>
    %178 = arith.mulf %176, %177 : vector<16x32xf32>
    %179 = vector.broadcast %158 : vector<1x32xf32> to vector<16x32xf32>
    %180 = arith.addf %178, %179 : vector<16x32xf32>
    %c0_77 = arith.constant 0 : index
    %c0_78 = arith.constant 0 : index
    %181 = vector.load %arg18[%c0_77, %c0_78] : memref<32x32xbf16, #tpu.memory_space<vmem>>, vector<32x32xbf16>
    %182 = arith.truncf %180 : vector<16x32xf32> to vector<16x32xbf16>
    %cst_79 = arith.constant dense<0.000000e+00> : vector<16x32xf32>
    %183 = tpu.matmul %182, %181, %cst_79 {dimension_numbers = #tpu.dot_dimension_numbers<[1], [0], [0], [1], [0, 0, 1, 1], [], []>} : vector<16x32xbf16>, vector<32x32xbf16>, vector<16x32xf32> -> vector<16x32xf32>
    %cst_80 = arith.constant 2.500000e-01 : f32
    %184 = vector.broadcast %cst_80 : f32 to vector<16x32xf32>
    %185 = arith.mulf %183, %184 : vector<16x32xf32>
    %c0_81 = arith.constant 0 : index
    %c0_82 = arith.constant 0 : index
    %186 = vector.load %arg19[%c0_81, %c0_82] : memref<32x32xbf16, #tpu.memory_space<vmem>>, vector<32x32xbf16>
    %187 = arith.truncf %180 : vector<16x32xf32> to vector<16x32xbf16>
    %cst_83 = arith.constant dense<0.000000e+00> : vector<16x32xf32>
    %188 = tpu.matmul %187, %186, %cst_83 {dimension_numbers = #tpu.dot_dimension_numbers<[1], [0], [0], [1], [0, 0, 1, 1], [], []>} : vector<16x32xbf16>, vector<32x32xbf16>, vector<16x32xf32> -> vector<16x32xf32>
    %c0_84 = arith.constant 0 : index
    %c0_85 = arith.constant 0 : index
    %189 = vector.load %arg20[%c0_84, %c0_85] : memref<32x32xbf16, #tpu.memory_space<vmem>>, vector<32x32xbf16>
    %190 = arith.truncf %180 : vector<16x32xf32> to vector<16x32xbf16>
    %cst_86 = arith.constant dense<0.000000e+00> : vector<16x32xf32>
    %191 = tpu.matmul %190, %189, %cst_86 {dimension_numbers = #tpu.dot_dimension_numbers<[1], [0], [0], [1], [0, 0, 1, 1], [], []>} : vector<16x32xbf16>, vector<32x32xbf16>, vector<16x32xf32> -> vector<16x32xf32>
    %192 = vector.shape_cast %185 : vector<16x32xf32> to vector<2x8x32xf32>
    %193 = vector.shape_cast %188 : vector<16x32xf32> to vector<2x8x32xf32>
    %194 = vector.shape_cast %191 : vector<16x32xf32> to vector<2x8x32xf32>
    %195 = vector.extract_strided_slice %192 {offsets = [0, 0, 0], sizes = [2, 8, 16], strides = [1, 1, 1]} : vector<2x8x32xf32> to vector<2x8x16xf32>
    %196 = arith.truncf %195 : vector<2x8x16xf32> to vector<2x8x16xbf16>
    %197 = vector.extract_strided_slice %193 {offsets = [0, 0, 0], sizes = [2, 8, 16], strides = [1, 1, 1]} : vector<2x8x32xf32> to vector<2x8x16xf32>
    %198 = arith.truncf %197 : vector<2x8x16xf32> to vector<2x8x16xbf16>
    %199 = vector.extract_strided_slice %194 {offsets = [0, 0, 0], sizes = [2, 8, 16], strides = [1, 1, 1]} : vector<2x8x32xf32> to vector<2x8x16xf32>
    %200 = arith.truncf %199 : vector<2x8x16xf32> to vector<2x8x16xbf16>
    "tpu.trace_start"() <{level = 10 : i32, message = "bqd,bkd->bqk"}> : () -> ()
    %cst_87 = arith.constant dense<0.000000e+00> : vector<2x8x8xf32>
    %201 = tpu.matmul %196, %198, %cst_87 {dimension_numbers = #tpu.dot_dimension_numbers<[2], [2], [1], [1], [0, 0, 0, 1, 1, 1], [0], [0]>} : vector<2x8x16xbf16>, vector<2x8x16xbf16>, vector<2x8x8xf32> -> vector<2x8x8xf32>
    %cst_88 = arith.constant -1.000000e+30 : f32
    "tpu.trace_stop"() : () -> ()
    %202 = vector.shape_cast %15 : vector<8x8xi1> to vector<1x8x8xi1>
    %203 = vector.broadcast %202 : vector<1x8x8xi1> to vector<2x8x8xi1>
    %204 = vector.broadcast %cst_88 : f32 to vector<2x8x8xf32>
    %205 = arith.select %203, %204, %201 : vector<2x8x8xi1>, vector<2x8x8xf32>
    %cst_89 = arith.constant dense<0xFF800000> : vector<2x8xf32>
    %206 = vector.multi_reduction <maximumf>, %205, %cst_89 [2] : vector<2x8x8xf32> to vector<2x8xf32>
    %207 = vector.shape_cast %206 : vector<2x8xf32> to vector<2x8x1xf32>
    %208 = vector.broadcast %207 : vector<2x8x1xf32> to vector<2x8x8xf32>
    %209 = arith.subf %205, %208 : vector<2x8x8xf32>
    %210 = math.exp %209 : vector<2x8x8xf32>
    %cst_90 = arith.constant dense<0.000000e+00> : vector<2x8xf32>
    %211 = vector.multi_reduction <add>, %210, %cst_90 [2] : vector<2x8x8xf32> to vector<2x8xf32>
    %212 = vector.shape_cast %211 : vector<2x8xf32> to vector<2x8x1xf32>
    %213 = vector.broadcast %212 : vector<2x8x1xf32> to vector<2x8x8xf32>
    %214 = arith.divf %210, %213 : vector<2x8x8xf32>
    %215 = arith.truncf %214 : vector<2x8x8xf32> to vector<2x8x8xbf16>
    "tpu.trace_start"() <{level = 10 : i32, message = "bqk,bkd->bqd"}> : () -> ()
    %cst_91 = arith.constant dense<0.000000e+00> : vector<2x8x16xf32>
    %216 = tpu.matmul %215, %200, %cst_91 {dimension_numbers = #tpu.dot_dimension_numbers<[2], [1], [1], [2], [0, 0, 0, 1, 1, 2], [0], [0]>} : vector<2x8x8xbf16>, vector<2x8x16xbf16>, vector<2x8x16xf32> -> vector<2x8x16xf32>
    "tpu.trace_stop"() : () -> ()
    %217 = vector.extract_strided_slice %192 {offsets = [0, 0, 16], sizes = [2, 8, 16], strides = [1, 1, 1]} : vector<2x8x32xf32> to vector<2x8x16xf32>
    %218 = arith.truncf %217 : vector<2x8x16xf32> to vector<2x8x16xbf16>
    %219 = vector.extract_strided_slice %193 {offsets = [0, 0, 16], sizes = [2, 8, 16], strides = [1, 1, 1]} : vector<2x8x32xf32> to vector<2x8x16xf32>
    %220 = arith.truncf %219 : vector<2x8x16xf32> to vector<2x8x16xbf16>
    %221 = vector.extract_strided_slice %194 {offsets = [0, 0, 16], sizes = [2, 8, 16], strides = [1, 1, 1]} : vector<2x8x32xf32> to vector<2x8x16xf32>
    %222 = arith.truncf %221 : vector<2x8x16xf32> to vector<2x8x16xbf16>
    "tpu.trace_start"() <{level = 10 : i32, message = "bqd,bkd->bqk"}> : () -> ()
    %cst_92 = arith.constant dense<0.000000e+00> : vector<2x8x8xf32>
    %223 = tpu.matmul %218, %220, %cst_92 {dimension_numbers = #tpu.dot_dimension_numbers<[2], [2], [1], [1], [0, 0, 0, 1, 1, 1], [0], [0]>} : vector<2x8x16xbf16>, vector<2x8x16xbf16>, vector<2x8x8xf32> -> vector<2x8x8xf32>
    %cst_93 = arith.constant -1.000000e+30 : f32
    "tpu.trace_stop"() : () -> ()
    %224 = vector.shape_cast %15 : vector<8x8xi1> to vector<1x8x8xi1>
    %225 = vector.broadcast %224 : vector<1x8x8xi1> to vector<2x8x8xi1>
    %226 = vector.broadcast %cst_93 : f32 to vector<2x8x8xf32>
    %227 = arith.select %225, %226, %223 : vector<2x8x8xi1>, vector<2x8x8xf32>
    %cst_94 = arith.constant dense<0xFF800000> : vector<2x8xf32>
    %228 = vector.multi_reduction <maximumf>, %227, %cst_94 [2] : vector<2x8x8xf32> to vector<2x8xf32>
    %229 = vector.shape_cast %228 : vector<2x8xf32> to vector<2x8x1xf32>
    %230 = vector.broadcast %229 : vector<2x8x1xf32> to vector<2x8x8xf32>
    %231 = arith.subf %227, %230 : vector<2x8x8xf32>
    %232 = math.exp %231 : vector<2x8x8xf32>
    %cst_95 = arith.constant dense<0.000000e+00> : vector<2x8xf32>
    %233 = vector.multi_reduction <add>, %232, %cst_95 [2] : vector<2x8x8xf32> to vector<2x8xf32>
    %234 = vector.shape_cast %233 : vector<2x8xf32> to vector<2x8x1xf32>
    %235 = vector.broadcast %234 : vector<2x8x1xf32> to vector<2x8x8xf32>
    %236 = arith.divf %232, %235 : vector<2x8x8xf32>
    %237 = arith.truncf %236 : vector<2x8x8xf32> to vector<2x8x8xbf16>
    "tpu.trace_start"() <{level = 10 : i32, message = "bqk,bkd->bqd"}> : () -> ()
    %cst_96 = arith.constant dense<0.000000e+00> : vector<2x8x16xf32>
    %238 = tpu.matmul %237, %222, %cst_96 {dimension_numbers = #tpu.dot_dimension_numbers<[2], [1], [1], [2], [0, 0, 0, 1, 1, 2], [0], [0]>} : vector<2x8x8xbf16>, vector<2x8x16xbf16>, vector<2x8x16xf32> -> vector<2x8x16xf32>
    "tpu.trace_stop"() : () -> ()
    %239 = tpu.concatenate %216, %238 in 2 : vector<2x8x16xf32>, vector<2x8x16xf32> -> vector<2x8x32xf32>
    %240 = vector.shape_cast %239 : vector<2x8x32xf32> to vector<16x32xf32>
    %c0_97 = arith.constant 0 : index
    %c0_98 = arith.constant 0 : index
    %241 = vector.load %arg21[%c0_97, %c0_98] : memref<32x32xbf16, #tpu.memory_space<vmem>>, vector<32x32xbf16>
    %242 = arith.truncf %240 : vector<16x32xf32> to vector<16x32xbf16>
    %cst_99 = arith.constant dense<0.000000e+00> : vector<16x32xf32>
    %243 = tpu.matmul %242, %241, %cst_99 {dimension_numbers = #tpu.dot_dimension_numbers<[1], [0], [0], [1], [0, 0, 1, 1], [], []>} : vector<16x32xbf16>, vector<32x32xbf16>, vector<16x32xf32> -> vector<16x32xf32>
    %c0_100 = arith.constant 0 : index
    %c0_101 = arith.constant 0 : index
    %244 = vector.load %arg22[%c0_100, %c0_101] : memref<1x32xf32, #tpu.memory_space<vmem>>, vector<1x32xf32>
    %245 = vector.broadcast %244 : vector<1x32xf32> to vector<16x32xf32>
    %246 = arith.addf %243, %245 : vector<16x32xf32>
    %247 = arith.addf %156, %246 : vector<16x32xf32>
    %c0_102 = arith.constant 0 : index
    %c0_103 = arith.constant 0 : index
    %248 = vector.load %arg23[%c0_102, %c0_103] : memref<1x32xf32, #tpu.memory_space<vmem>>, vector<1x32xf32>
    %c0_104 = arith.constant 0 : index
    %c0_105 = arith.constant 0 : index
    %249 = vector.load %arg24[%c0_104, %c0_105] : memref<1x32xf32, #tpu.memory_space<vmem>>, vector<1x32xf32>
    %cst_106 = arith.constant dense<0.000000e+00> : vector<16xf32>
    %250 = vector.multi_reduction <add>, %247, %cst_106 [1] : vector<16x32xf32> to vector<16xf32>
    %251 = vector.shape_cast %250 : vector<16xf32> to vector<16x1xf32>
    %cst_107 = arith.constant 3.200000e+01 : f32
    %252 = vector.broadcast %cst_107 : f32 to vector<16x1xf32>
    %253 = arith.divf %251, %252 : vector<16x1xf32>
    %254 = vector.broadcast %253 : vector<16x1xf32> to vector<16x32xf32>
    %255 = arith.subf %247, %254 : vector<16x32xf32>
    %256 = arith.mulf %255, %255 : vector<16x32xf32>
    %cst_108 = arith.constant dense<0.000000e+00> : vector<16xf32>
    %257 = vector.multi_reduction <add>, %256, %cst_108 [1] : vector<16x32xf32> to vector<16xf32>
    %258 = vector.shape_cast %257 : vector<16xf32> to vector<16x1xf32>
    %cst_109 = arith.constant 3.200000e+01 : f32
    %259 = vector.broadcast %cst_109 : f32 to vector<16x1xf32>
    %260 = arith.divf %258, %259 : vector<16x1xf32>
    %261 = vector.broadcast %253 : vector<16x1xf32> to vector<16x32xf32>
    %262 = arith.subf %247, %261 : vector<16x32xf32>
    %cst_110 = arith.constant 9.99999974E-6 : f32
    %263 = vector.broadcast %cst_110 : f32 to vector<16x1xf32>
    %264 = arith.addf %260, %263 : vector<16x1xf32>
    %265 = math.sqrt %264 : vector<16x1xf32>
    %266 = vector.broadcast %265 : vector<16x1xf32> to vector<16x32xf32>
    %267 = arith.divf %262, %266 : vector<16x32xf32>
    %268 = vector.broadcast %248 : vector<1x32xf32> to vector<16x32xf32>
    %269 = arith.mulf %267, %268 : vector<16x32xf32>
    %270 = vector.broadcast %249 : vector<1x32xf32> to vector<16x32xf32>
    %271 = arith.addf %269, %270 : vector<16x32xf32>
    %c0_111 = arith.constant 0 : index
    %c0_112 = arith.constant 0 : index
    %272 = vector.load %arg25[%c0_111, %c0_112] : memref<32x128xbf16, #tpu.memory_space<vmem>>, vector<32x128xbf16>
    %273 = arith.truncf %271 : vector<16x32xf32> to vector<16x32xbf16>
    %cst_113 = arith.constant dense<0.000000e+00> : vector<16x128xf32>
    %274 = tpu.matmul %273, %272, %cst_113 {dimension_numbers = #tpu.dot_dimension_numbers<[1], [0], [0], [1], [0, 0, 1, 1], [], []>} : vector<16x32xbf16>, vector<32x128xbf16>, vector<16x128xf32> -> vector<16x128xf32>
    %c0_114 = arith.constant 0 : index
    %c0_115 = arith.constant 0 : index
    %275 = vector.load %arg26[%c0_114, %c0_115] : memref<1x128xf32, #tpu.memory_space<vmem>>, vector<1x128xf32>
    %276 = vector.broadcast %275 : vector<1x128xf32> to vector<16x128xf32>
    %277 = arith.addf %274, %276 : vector<16x128xf32>
    %cst_116 = arith.constant 5.000000e-01 : f32
    %278 = vector.broadcast %cst_116 : f32 to vector<16x128xf32>
    %279 = arith.mulf %278, %277 : vector<16x128xf32>
    %280 = arith.mulf %277, %277 : vector<16x128xf32>
    %281 = arith.mulf %277, %280 : vector<16x128xf32>
    %cst_117 = arith.constant 4.471500e-02 : f32
    %282 = vector.broadcast %cst_117 : f32 to vector<16x128xf32>
    %283 = arith.mulf %282, %281 : vector<16x128xf32>
    %284 = arith.addf %277, %283 : vector<16x128xf32>
    %cst_118 = arith.constant 0.797884583 : f32
    %285 = vector.broadcast %cst_118 : f32 to vector<16x128xf32>
    %286 = arith.mulf %285, %284 : vector<16x128xf32>
    %287 = math.tanh %286 : vector<16x128xf32>
    %cst_119 = arith.constant 1.000000e+00 : f32
    %288 = vector.broadcast %cst_119 : f32 to vector<16x128xf32>
    %289 = arith.addf %288, %287 : vector<16x128xf32>
    %290 = arith.mulf %279, %289 : vector<16x128xf32>
    %c0_120 = arith.constant 0 : index
    %c0_121 = arith.constant 0 : index
    %291 = vector.load %arg27[%c0_120, %c0_121] : memref<128x32xbf16, #tpu.memory_space<vmem>>, vector<128x32xbf16>
    %292 = arith.truncf %290 : vector<16x128xf32> to vector<16x128xbf16>
    %cst_122 = arith.constant dense<0.000000e+00> : vector<16x32xf32>
    %293 = tpu.matmul %292, %291, %cst_122 {dimension_numbers = #tpu.dot_dimension_numbers<[1], [0], [0], [1], [0, 0, 1, 1], [], []>} : vector<16x128xbf16>, vector<128x32xbf16>, vector<16x32xf32> -> vector<16x32xf32>
    %c0_123 = arith.constant 0 : index
    %c0_124 = arith.constant 0 : index
    %294 = vector.load %arg28[%c0_123, %c0_124] : memref<1x32xf32, #tpu.memory_space<vmem>>, vector<1x32xf32>
    %295 = vector.broadcast %294 : vector<1x32xf32> to vector<16x32xf32>
    %296 = arith.addf %293, %295 : vector<16x32xf32>
    %297 = arith.addf %247, %296 : vector<16x32xf32>
    %cst_125 = arith.constant dense<0.000000e+00> : vector<16xf32>
    %298 = vector.multi_reduction <add>, %297, %cst_125 [1] : vector<16x32xf32> to vector<16xf32>
    %299 = vector.shape_cast %298 : vector<16xf32> to vector<16x1xf32>
    %cst_126 = arith.constant 3.200000e+01 : f32
    %300 = vector.broadcast %cst_126 : f32 to vector<16x1xf32>
    %301 = arith.divf %299, %300 : vector<16x1xf32>
    %302 = vector.broadcast %301 : vector<16x1xf32> to vector<16x32xf32>
    %303 = arith.subf %297, %302 : vector<16x32xf32>
    %304 = arith.mulf %303, %303 : vector<16x32xf32>
    %cst_127 = arith.constant dense<0.000000e+00> : vector<16xf32>
    %305 = vector.multi_reduction <add>, %304, %cst_127 [1] : vector<16x32xf32> to vector<16xf32>
    %306 = vector.shape_cast %305 : vector<16xf32> to vector<16x1xf32>
    %cst_128 = arith.constant 3.200000e+01 : f32
    %307 = vector.broadcast %cst_128 : f32 to vector<16x1xf32>
    %308 = arith.divf %306, %307 : vector<16x1xf32>
    %309 = vector.broadcast %301 : vector<16x1xf32> to vector<16x32xf32>
    %310 = arith.subf %297, %309 : vector<16x32xf32>
    %cst_129 = arith.constant 9.99999974E-6 : f32
    %311 = vector.broadcast %cst_129 : f32 to vector<16x1xf32>
    %312 = arith.addf %308, %311 : vector<16x1xf32>
    %313 = math.sqrt %312 : vector<16x1xf32>
    %314 = vector.broadcast %313 : vector<16x1xf32> to vector<16x32xf32>
    %315 = arith.divf %310, %314 : vector<16x32xf32>
    %316 = vector.broadcast %0 : vector<1x32xf32> to vector<16x32xf32>
    %317 = arith.mulf %315, %316 : vector<16x32xf32>
    %318 = vector.broadcast %1 : vector<1x32xf32> to vector<16x32xf32>
    %319 = arith.addf %317, %318 : vector<16x32xf32>
    %320 = arith.truncf %319 : vector<16x32xf32> to vector<16x32xbf16>
    %cst_130 = arith.constant dense<0.000000e+00> : vector<16x128xf32>
    %321 = tpu.matmul %320, %2, %cst_130 {dimension_numbers = #tpu.dot_dimension_numbers<[1], [0], [0], [1], [0, 0, 1, 1], [], []>} : vector<16x32xbf16>, vector<32x128xbf16>, vector<16x128xf32> -> vector<16x128xf32>
    %322 = vector.shape_cast %321 : vector<16x128xf32> to vector<2x8x128xf32>
    %c0_131 = arith.constant 0 : index
    %c0_132 = arith.constant 0 : index
    %c0_133 = arith.constant 0 : index
    %323 = vector.load %arg32[%c0_131, %c0_132, %c0_133] : memref<2x8x128xf32, #tpu.memory_space<vmem>>, vector<2x8x128xf32>
    tpu.vector_store %arg32[%c0_131, %c0_132, %c0_133], %322 {strides = array<i32>} : memref<2x8x128xf32, #tpu.memory_space<vmem>>, vector<2x8x128xf32>,
    return
  }
}

</mosaic_0001>

<bundles_post_ra>
// kernel: gpt_forward.1
= control target key start
LH: loop header
LB: loop body
LE: loop exit
PB: predicated region body
PF: predicated region fallthrough
CT: control target
= control target key end

     0   :  { %s2289_s6 = smov 1   ;;  %s2290_s10 = smov 2   ;;  %s2839_s0 = inlined_call_operand.smem [shape: u32[33], index: -1, kind: input, shape index: {}] }
   0x1   :  { %s2337_s5 = sld [smem:[%s2839_s0]]   ;;  %s2291_s14 = smov 3  }
   0x2   :  { %s2342_s9 = sld [smem:[%s2839_s0 + %s2289_s6]]   ;;  %s2292_s18 = smov 4  }
   0x3   :  { %s2347_s13 = sld [smem:[%s2839_s0 + %s2290_s10]]   ;;  %s2293_s22 = smov 5  }
   0x4   :  { %s2352_s17 = sld [smem:[%s2839_s0 + %s2291_s14]]   ;;  %s2294_s26 = smov 6  }
   0x5   :  { %s2357_s21 = sld [smem:[%s2839_s0 + %s2292_s18]]   ;;  %s2295_s30 = smov 7  }
   0x6   :  { %s2362_s25 = sld [smem:[%s2839_s0 + %s2293_s22]]   ;;  %s2296_s4 = smov 8  }
   0x7   :  { %s2367_s29 = sld [smem:[%s2839_s0 + %s2294_s26]]   ;;  %s2297_s10 = smov 9  }
   0x8   :  { %s2372_s3 = sld [smem:[%s2839_s0 + %s2295_s30]]   ;;  %s2298_s15 = smov 10  }
   0x9   :  { %s2377_s8 = sld [smem:[%s2839_s0 + %s2296_s4]]   ;;  %s2299_s20 = smov 11  }
   0xa   :  { %s2382_s14 = sld [smem:[%s2839_s0 + %s2297_s10]]   ;;  %s2300_s26 = smov 12  }
   0xb   :  { %s2387_s19 = sld [smem:[%s2839_s0 + %s2298_s15]]   ;;  %s2301_s1 = smov 13  }
   0xc   :  { %s2392_s24 = sld [smem:[%s2839_s0 + %s2299_s20]]   ;;  %s2302_s7 = smov 14  }
   0xd   :  { %s2397_s30 = sld [smem:[%s2839_s0 + %s2300_s26]]   ;;  %s2303_s15 = smov 15  }
   0xe   :  { %s2402_s6 = sld [smem:[%s2839_s0 + %s2301_s1]]   ;;  %s2304_s22 = smov 16  }
   0xf   :  { %s2407_s12 = sld [smem:[%s2839_s0 + %s2302_s7]]   ;;  %s2305_s28 = smov 17  }
  0x10   :  { %s2412_s20 = sld [smem:[%s2839_s0 + %s2303_s15]]   ;;  %s2306_s7 = smov 18  }
  0x11   :  { %s2417_s27 = sld [smem:[%s2839_s0 + %s2304_s22]]   ;;  %s2307_s15 = smov 19  }
  0x12   :  { %s2422_s4 = sld [smem:[%s2839_s0 + %s2305_s28]]   ;;  %s2308_s22 = smov 20  }
  0x13   :  { %s2309_s28 = smov 21  }
  0x14   :  { %2846 = sst [smem:[#allocation5_spill]] %s2402_s6 }
  0x15   :  { %s2427_s6 = sld [smem:[%s2839_s0 + %s2306_s7]]   ;;  %s2310_s7 = smov 22  }
  0x16   :  { %2847 = sst [smem:[#allocation6_spill]] %s2412_s20 }
  0x17   :  { %2848 = sst [smem:[#allocation7_spill]] %s2417_s27 }
  0x18   :  { %2849 = sst [smem:[#allocation8_spill]] %s2422_s4 }
  0x19   :  { %s2432_s20 = sld [smem:[%s2839_s0 + %s2307_s15]]   ;;  %s2311_s15 = smov 23  }
  0x1a   :  { %s2437_s27 = sld [smem:[%s2839_s0 + %s2308_s22]]   ;;  %s2312_s22 = smov 24  }
  0x1b   :  { %2850 = sst [smem:[#allocation9_spill]] %s2427_s6 }
  0x1c   :  { %s2442_s4 = sld [smem:[%s2839_s0 + %s2309_s28]]   ;;  %s2313_s28 = smov 25  }
  0x1d   :  { %s2447_s6 = sld [smem:[%s2839_s0 + %s2310_s7]]   ;;  %s2314_s7 = smov 26  }
  0x1f   :  { %2851 = sst [smem:[#allocation10_spill]] %s2432_s20 }
  0x20   :  { %2852 = sst [smem:[#allocation11_spill]] %s2437_s27 }
  0x21   :  { %s2452_s20 = sld [smem:[%s2839_s0 + %s2311_s15]]   ;;  %s2315_s15 = smov 27  }
  0x22   :  { %2853 = sst [smem:[#allocation12_spill]] %s2442_s4 }
  0x23   :  { %2854 = sst [smem:[#allocation13_spill]] %s2447_s6 }
  0x24   :  { %s2457_s27 = sld [smem:[%s2839_s0 + %s2312_s22]]   ;;  %s2316_s22 = smov 28  }
  0x25   :  { %s2462_s4 = sld [smem:[%s2839_s0 + %s2313_s28]]   ;;  %s2317_s28 = smov 29  }
  0x26   :  { %s2467_s6 = sld [smem:[%s2839_s0 + %s2314_s7]]   ;;  %s2318_s7 = smov 30  }
  0x27   :  { %2855 = sst [smem:[#allocation14_spill]] %s2452_s20 }
  0x28   :  { %s2472_s20 = sld [smem:[%s2839_s0 + %s2315_s15]]   ;;  %s2319_s15 = smov 31  }
  0x2a   :  { %2856 = sst [smem:[#allocation15_spill]] %s2457_s27 }
  0x2b   :  { %2857 = sst [smem:[#allocation16_spill]] %s2462_s4 }
  0x2c   :  { %2858 = sst [smem:[#allocation17_spill]] %s2467_s6 }
  0x2d   :  { %s2477_s27 = sld [smem:[%s2839_s0 + %s2316_s22]]   ;;  %s2320_s22 = smov 32  }
  0x2e   :  { %2859 = sst [smem:[#allocation18_spill]] %s2472_s20 }
  0x2f   :  { %s2482_s4 = sld [smem:[%s2839_s0 + %s2317_s28]]  }
  0x30   :  { %s2487_s6 = sld [smem:[%s2839_s0 + %s2318_s7]]  }
  0x31   :  { %s2492_s20 = sld [smem:[%s2839_s0 + %s2319_s15]]  }
  0x33   :  { %2860 = sst [smem:[#allocation19_spill]] %s2477_s27 }
  0x34   :  { %s2497_s27 = sld [smem:[%s2839_s0 + %s2320_s22]]  }
  0x35   :  { %v142_v0 = vld [vmem:[%s2337_s5] sm:$0xff]  ;;  %v173_v1 = vld [vmem:[%s2342_s9 + $0x78] sm:$0xff]  ;;  %v2321_v2 = vmov 0   ;;  %v172_v3 = vld [vmem:[%s2342_s9 + $0x70] sm:$0xff] }
  0x36   :  { %2154 = vset.pattern.permute.xlu0 %v2321_v2  ;;  %176 = vmatpush.msra.mxu0 %v173_v1  ;;  %v171_v4 = vld [vmem:[%s2342_s9 + $0x68] sm:$0xff]  ;;  %v170_v5 = vld [vmem:[%s2342_s9 + $0x60] sm:$0xff]  ;;  %v169_v7 = vld [vmem:[%s2342_s9 + $0x58] sm:$0xff] }
  0x37   :  { %147 = vperm.xlu0 %2154, %v142_v0   ;;  %v143_v6 = vld [vmem:[%s2337_s5 + $0x8] sm:$0xff]  ;;  %v168_v8 = vld [vmem:[%s2342_s9 + $0x50] sm:$0xff] }
  0x38   :  { %177 = vmatpush.msra.mxu0 %v172_v3  ;;  %v167_v9 = vld [vmem:[%s2342_s9 + $0x48] sm:$0xff] }
  0x3a   :  { %178 = vmatpush.msra.mxu0 %v171_v4 }
  0x3c   :  { %179 = vmatpush.msra.mxu0 %v170_v5 }
  0x3e   :  { %180 = vmatpush.msra.mxu0 %v169_v7 }
  0x3f   :  { %150 = vperm.xlu0 %2154, %v143_v6  }
  0x40   :  { %181 = vmatpush.msra.mxu0 %v168_v8 }
  0x41   :  { %70 = vsyncpa [#allocation3], 0  ;;  %v166_v10 = vld [vmem:[%s2342_s9 + $0x40] sm:$0xff]  ;;  %v165_v11 = vld [vmem:[%s2342_s9 + $0x38] sm:$0xff]  ;;  %v144_v19 = vlaneseq  ;;  %v2322_v22 = vmov 1.0   ;;  %vm204_vm2 = vcmask 261120  }
  0x42   :  { %182 = vmatpush.msra.mxu0 %v167_v9  ;;  %v164_v12 = vld [vmem:[%s2342_s9 + $0x30] sm:$0xff]  ;;  %v163_v13 = vld [vmem:[%s2342_s9 + $0x28] sm:$0xff]  ;;  %v162_v14 = vld [vmem:[%s2342_s9 + $0x20] sm:$0xff]  ;;  %v2323_v32 = vmov 32.0   ;;  %s2324_s0 = smov 112   ;;  %s2325_s5 = smov 16  }
  0x43   :  { %v161_v15 = vld [vmem:[%s2342_s9 + $0x18] sm:$0xff]  ;;  %v160_v16 = vld [vmem:[%s2342_s9 + $0x10] sm:$0xff]  ;;  %v159_v17 = vld [vmem:[%s2342_s9 + $0x8] sm:$0xff]  ;;  %v2518_v20 = vand.u32 127, %v144_v19  ;;  %2181 = vrcp.f32 %v2323_v32  ;;  %s2876_s28 = sld [smem:[#allocation17_spill]]  ;;  %s1849_s2 = sshll.u32 %s2497_s27, 4  ;;  %s1850_s2 = int_to_ptr.hbm [resolvable:$true] %s1849_s2 }
  0x44   :  { %183 = vmatpush.msra.mxu0 %v166_v10  ;;  %v158_v18 = vld [vmem:[%s2342_s9] sm:$0xff]  ;;  %v175_v28 = vld [vmem:[%s2347_s13 + $0x8] sm:$0xff]  ;;  %s2863_s9 = sld [smem:[#allocation5_spill]]  ;;  %s2275_s7 = sshra.s32 %s1850_s2, 4  ;;  %s2276_s7 = int_to_ptr.hbm [resolvable:$true] %s2275_s7 }
  0x45   :  { %v174_v24 = vld [vmem:[%s2347_s13] sm:$0xff]  ;;  %v2079_v49 = vld [vmem:[%s2362_s25 + $0x8] sm:$0xff]  ;;  %s2864_s13 = sld [smem:[#allocation6_spill]]  ;;  %s2279_s10 = scalar_lea.hbm %s2497_s27, 16 }
  0x46   :  { %184 = vmatpush.msra.mxu0 %v165_v11  ;;  %v2081_v50 = vld [vmem:[%s2367_s29 + $0x8] sm:$0xff]  ;;  %324 = vmatpush.bf16.msra.mxu1 %v2079_v49  ;;  %v2078_v53 = vld [vmem:[%s2362_s25] sm:$0xff]  ;;  %s2867_s25 = sld [smem:[#allocation11_spill]]  ;;  %p2280_p1 = scmp.lt.s32.totalorder %s2276_s7, %s2497_s27 }
  0x47   :  { %v2083_v51 = vld [vmem:[%s2372_s3 + $0x8] sm:$0xff]  ;;  %356 = vmatpush.bf16.msra.mxu2 %v2081_v50  ;;  %v2080_v54 = vld [vmem:[%s2367_s29] sm:$0xff]  ;;  %s2868_s29 = sld [smem:[#allocation7_spill]] }
  0x48   :  { %185 = vmatpush.msra.mxu0 %v164_v12  ;;  %386 = vmatpush.bf16.msra.mxu3 %v2083_v51  ;;  %v2082_v56 = vld [vmem:[%s2372_s3] sm:$0xff]  ;;  %s2869_s3 = sld [smem:[#allocation8_spill]] }
  0x49   :  { %v2182_v33 = vpop.eup %2181  ;;  %s2877_s1 = sld [smem:[#allocation19_spill]] }
  0x4a   :  { %186 = vmatpush.msra.mxu0 %v163_v13  ;;  %v212_v34 = vmul.f32 32.0, %v2182_v33  ;;  %vm216_vm3 = vweird.f32 %v2182_v33  ;;  %325 = vmatpush.bf16.msra.mxu1 %v2078_v53 }
  0x4b   :  { %357 = vmatpush.bf16.msra.mxu2 %v2080_v54 }
  0x4c   :  { %187 = vmatpush.msra.mxu0 %v162_v14  ;;  %v213_v35 = vsub.f32 1.0, %v212_v34  ;;  %387 = vmatpush.bf16.msra.mxu3 %v2082_v56 }
  0x4e   :  { %188 = vmatpush.msra.mxu0 %v161_v15  ;;  %v214_v36 = vmul.f32 %v2182_v33, %v213_v35 }
  0x50   :  { %189 = vmatpush.msra.mxu0 %v160_v16  ;;  %v215_v37 = vadd.f32 %v2182_v33, %v214_v36 }
  0x52   :  { %190 = vmatpush.msra.mxu0 %v159_v17  ;;  %v2532_v38 = vsel %vm216_vm3, %v2182_v33, %v215_v37 }
  0x54   :  { %191 = vmatpush.msra.mxu0 %v158_v18 }
  0xa9   :  { %v148_v21 = vpop.permute.xlu0 %147 }
  0xaa   :  { %vm152_vm0 = vcmp.eq.s32.totalorder %v2518_v20, %v148_v21 }
  0xab   :  { %1895 = vmatmul.msk.f32.vlgmr.msra.gmra.mxu0 %vm152_vm0, %v2322_v22  ;;  %vm400_vm0 = vcmask 130048  }
  0xb1   :  { %v151_v23 = vpop.permute.xlu0 %150 }
  0xb2   :  { %vm153_vm1 = vcmp.eq.s32.totalorder %v2518_v20, %v151_v23 }
  0xb3   :  { %1896 = vmatmul.msk.f32.gmra.mxu0 %vm153_vm1, %v2322_v22  ;;  %vm497_vm1 = vcmask 1043456  }
 0x128   :  { %v193_v25 = vpop.f32.mrf.mxu0 }
 0x129   :  { %v2523_v26 = vadd.f32 %v193_v25, %v174_v24 }
 0x12b   :  { %v205_v27 = vsel %vm204_vm2, %v2523_v26, 0.0 }
 0x12c   :  { %206 = vadd.xlane.f32.xlu1 %v205_v27 }
 0x130   :  { %v196_v29 = vpop.f32.mrf.mxu0 }
 0x131   :  { %v2528_v30 = vadd.f32 %v196_v29, %v175_v28 }
 0x133   :  { %v208_v31 = vsel %vm204_vm2, %v2528_v30, 0.0 }
 0x134   :  { %209 = vadd.xlane.f32.xlu1 %v208_v31 }
 0x19f   :  { %v207_v39 = vpop.xlane.xlu1 %206 }
 0x1a0   :  { %v218_v40 = vmul.f32 %v2532_v38, %v207_v39 }
 0x1a2   :  { %v2536_v41 = vsub.f32 %v2523_v26, %v218_v40  ;;  %v2165_v40 = vld [vmem:[%s2352_s17] ss:$0 sm:$0xff]  ;;  %s2865_s17 = sld [smem:[#allocation9_spill]] }
 0x1a4   :  { %v222_v42 = vmul.f32 %v2536_v41, %v2536_v41 }
 0x1a6   :  { %v224_v43 = vsel %vm204_vm2, %v222_v42, 0.0 }
 0x1a7   :  { %225 = vadd.xlane.f32.xlu2 %v224_v43  ;;  %v210_v44 = vpop.xlane.xlu1 %209 }
 0x1a8   :  { %v219_v45 = vmul.f32 %v2532_v38, %v210_v44 }
 0x1aa   :  { %v2543_v46 = vsub.f32 %v2528_v30, %v219_v45 }
 0x1ac   :  { %v223_v47 = vmul.f32 %v2543_v46, %v2543_v46 }
 0x1ae   :  { %v227_v48 = vsel %vm204_vm2, %v223_v47, 0.0 }
 0x1af   :  { %228 = vadd.xlane.f32.xlu2 %v227_v48  ;;  %v2166_v48 = vld [vmem:[%s2357_s21] ss:$0 sm:$0xff]  ;;  %s2866_s21 = sld [smem:[#allocation10_spill]] }
 0x21a   :  { %v226_v52 = vpop.xlane.xlu2 %225 }
 0x21b   :  { %v230_v55 = vmul.f32 %v226_v52, %v2532_v38 }
 0x21d   :  { %v232_v57 = vadd.f32 1e-05, %v230_v55 }
 0x21f   :  { %2183 = vrsqrt.f32 %v232_v57  ;;  %vm241_vm4 = vcmp.eq.f32.partialorder %v232_v57, inf  ;;  %v244_v7 = vand.u32 2147483648, %v232_v57  ;;  %vm243_vm5 = vcmp.eq.f32.partialorder %v232_v57, 0.0 }
 0x222   :  { %v229_v58 = vpop.xlane.xlu2 %228 }
 0x223   :  { %v231_v59 = vmul.f32 %v229_v58, %v2532_v38 }
 0x225   :  { %v2184_v60 = vpop.eup %2183  ;;  %v233_v61 = vadd.f32 1e-05, %v231_v59 }
 0x226   :  { %v235_v62 = vmul.f32 %v2184_v60, %v232_v57 }
 0x227   :  { %2185 = vrsqrt.f32 %v233_v61  ;;  %vm253_vm6 = vcmp.eq.f32.partialorder %v233_v61, inf  ;;  %v256_v14 = vand.u32 2147483648, %v233_v61  ;;  %vm255_vm7 = vcmp.eq.f32.partialorder %v233_v61, 0.0 }
 0x228   :  { %v236_v63 = vmul.f32 %v2184_v60, %v235_v62 }
 0x22a   :  { %v237_v0 = vmul.f32 0.5, %v236_v63 }
 0x22c   :  { %v238_v1 = vsub.f32 1.5, %v237_v0 }
 0x22d   :  { %v2186_v2 = vpop.eup %2185 }
 0x22e   :  { %v239_v3 = vmul.f32 %v2184_v60, %v238_v1  ;;  %v247_v4 = vmul.f32 %v2186_v2, %v233_v61 }
 0x230   :  { %v240_v5 = vmul.f32 %v239_v3, %v232_v57  ;;  %v248_v6 = vmul.f32 %v2186_v2, %v247_v4 }
 0x232   :  { %v249_v8 = vmul.f32 0.5, %v248_v6  ;;  %v242_v9 = vsel %vm241_vm4, %v232_v57, %v240_v5  ;;  %vm443_vm4 = vcmask 64512  }
 0x233   :  { %v245_v10 = vsel %vm243_vm5, %v244_v7, %v242_v9 }
 0x234   :  { %v250_v11 = vsub.f32 1.5, %v249_v8  ;;  %2187 = vrcp.f32 %v245_v10  ;;  %v269_v23 = vand.u32 2147483648, %v245_v10  ;;  %vm263_vm9 = vweird.f32 %v245_v10 }
 0x235   :  { %v267_v25 = vand.u32 2147483647, %v245_v10 }
 0x236   :  { %v251_v12 = vmul.f32 %v2186_v2, %v250_v11  ;;  %v270_v31 = vor.u32 1.1754944e-38, %v269_v23 }
 0x237   :  { %vm268_vm11 = vcmp.eq.f32.partialorder %v267_v25, 8.507059e+37 }
 0x238   :  { %v252_v13 = vmul.f32 %v251_v12, %v233_v61 }
 0x23a   :  { %v2188_v15 = vpop.eup %2187  ;;  %v254_v16 = vsel %vm253_vm6, %v233_v61, %v252_v13 }
 0x23b   :  { %v257_v17 = vsel %vm255_vm7, %v256_v14, %v254_v16  ;;  %v259_v18 = vmul.f32 %v2188_v15, %v245_v10  ;;  %vm264_vm8 = vweird.f32 %v2188_v15  ;;  %v200_v14 = vshrl.u32 %v144_v19, 7 }
 0x23c   :  { %2189 = vrcp.f32 %v257_v17  ;;  %vm265_vm10 = vmor %vm263_vm9, %vm264_vm8  ;;  %v284_v34 = vand.u32 2147483648, %v257_v17  ;;  %v282_v36 = vand.u32 2147483647, %v257_v17  ;;  %vm278_vm13 = vweird.f32 %v257_v17 }
 0x23d   :  { %v260_v21 = vsub.f32 1.0, %v259_v18  ;;  %vm2579_vm3 = vcmp.gt.s32.totalorder %v2518_v20, %v200_v14 }
 0x23e   :  { %v285_v42 = vor.u32 1.1754944e-38, %v284_v34  ;;  %vm283_vm15 = vcmp.eq.f32.partialorder %v282_v36, 8.507059e+37 }
 0x23f   :  { %v261_v22 = vmul.f32 %v2188_v15, %v260_v21 }
 0x241   :  { %v262_v24 = vadd.f32 %v2188_v15, %v261_v22 }
 0x242   :  { %v2190_v27 = vpop.eup %2189 }
 0x243   :  { %v266_v28 = vsel %vm265_vm10, %v2188_v15, %v262_v24  ;;  %v274_v29 = vmul.f32 %v2190_v27, %v257_v17  ;;  %vm279_vm12 = vweird.f32 %v2190_v27 }
 0x244   :  { %v271_v33 = vsel %vm268_vm11, %v270_v31, %v266_v28  ;;  %vm280_vm14 = vmor %vm278_vm13, %vm279_vm12 }
 0x245   :  { %v275_v32 = vsub.f32 1.0, %v274_v29  ;;  %v272_v37 = vmul.f32 %v271_v33, %v2536_v41 }
 0x247   :  { %v276_v35 = vmul.f32 %v2190_v27, %v275_v32  ;;  %v291_v47 = vmul.f32 %v2165_v40, %v272_v37 }
 0x249   :  { %v277_v39 = vadd.f32 %v2190_v27, %v276_v35  ;;  %v296_v50 = vadd.f32 %v2166_v48, %v291_v47 }
 0x24b   :  { %v281_v43 = vsel %vm280_vm14, %v2190_v27, %v277_v39 }
 0x24c   :  { %v286_v44 = vsel %vm283_vm15, %v285_v42, %v281_v43 }
 0x24d   :  { %v287_v45 = vmul.f32 %v286_v44, %v2543_v46 }
 0x24f   :  { %v292_v49 = vmul.f32 %v2165_v40, %v287_v45 }
 0x251   :  { %v297_v51 = vadd.f32 %v2166_v48, %v292_v49 }
 0x253   :  { %v302_v52 = vpack.c.bf16 %v297_v51, %v296_v50 }
 0x255   :  { %1905 = vmatmul.msk.bf16.vlgmr.msra.gmra.mxu1 %vm204_vm2, %v302_v52  ;;  %1914 = vmatmul.msk.bf16.vlgmr.msra.gmra.mxu2 %vm204_vm2, %v302_v52 }
 0x256   :  { %1923 = vmatmul.msk.bf16.vlgmr.msra.gmra.mxu3 %vm204_vm2, %v302_v52 }
 0x2d2   :  { %v327_v41 = vpop.f32.mrf.mxu1 }
 0x2d3   :  { %v332_v54 = vmul.f32 0.25, %v327_v41 }
 0x2d5   :  { %v394_v60 = vpack.c.bf16 %v332_v54, %v332_v54 }
 0x2d7   :  { %v534_v0 = vunpack.c.l.b16 %v394_v60 }
 0x2d8   :  { %v359_v53 = vpop.f32.mrf.mxu2 }
 0x2d9   :  { %v396_v55 = vpack.c.bf16 %v359_v53, %v359_v53  ;;  %v389_v56 = vpop.f32.mrf.mxu3  ;;  %v535_v7 = vpack.c.b16 %v534_v0, %v534_v0 }
 0x2da   :  { %v2563_v46 = vpack.c.bf16 %v389_v56, %v389_v56  ;;  %v329_v62 = vpop.f32.mrf.mxu1 }
 0x2db   :  { %v539_v57 = vunpack.c.l.b16 %v396_v55  ;;  %v405_v58 = vsel %vm400_vm0, %v396_v55, 0  ;;  %v333_v1 = vmul.f32 0.25, %v329_v62 }
 0x2dc   :  { %414 = vmatpush.bf16.xpose.msrb.mxu1 %v405_v58  ;;  %v499_v59 = vsel %vm497_vm1, %v2563_v46, 0 }
 0x2dd   :  { %v540_v61 = vpack.c.b16 %v539_v57, %v539_v57  ;;  %508 = vmatpush.bf16.msrb.mxu3 %v499_v59  ;;  %v395_v8 = vpack.c.bf16 %v333_v1, %v333_v1 }
 0x2df   :  { %541 = vrot.lane.b32.xlu2 %v540_v61, %s2324_s0  ;;  %v563_v9 = vunpack.c.l.b16 %v395_v8 }
 0x2e0   :  { %v361_v63 = vpop.f32.mrf.mxu2 }
 0x2e1   :  { %v397_v2 = vpack.c.bf16 %v361_v63, %v361_v63  ;;  %v391_v3 = vpop.f32.mrf.mxu3  ;;  %v564_v10 = vpack.c.b16 %v563_v9, %v563_v9 }
 0x2e2   :  { %v399_v4 = vpack.c.bf16 %v391_v3, %v391_v3 }
 0x2e3   :  { %1924 = vmatmul.msk.bf16.vlgmr.msrb.gmra.mxu1 %vm400_vm0, %v394_v60  ;;  %v424_v5 = vsel %vm400_vm0, %v397_v2, 0  ;;  %v568_v33 = vunpack.c.l.b16 %v397_v2 }
 0x2e4   :  { %v518_v6 = vsel %vm497_vm1, %v399_v4, 0  ;;  %433 = vmatpush.bf16.xpose.msrb.mxu2 %v424_v5  ;;  %v668_v37 = vunpack.c.l.b16 %v399_v4 }
 0x2e5   :  { %527 = vmatpush.bf16.msra.mxu1 %v518_v6  ;;  %v569_v34 = vpack.c.b16 %v568_v33, %v568_v33 }
 0x2e6   :  { %v669_v39 = vpack.c.b16 %v668_v37, %v668_v37 }
 0x2e7   :  { %536 = vrot.lane.b32.xlu2 %v535_v7, %s2324_s0 }
 0x2eb   :  { %1925 = vmatmul.msk.bf16.vlgmr.msrb.gmra.mxu2 %vm400_vm0, %v395_v8 }
 0x2ef   :  { %565 = vrot.lane.b32.xlu2 %v564_v10, %s2324_s0 }
 0x339   :  { %v542_v11 = vpop.permute.xlu2 %541 }
 0x33a   :  { %v547_v12 = vsel %vm400_vm0, %v542_v11, 0 }
 0x33b   :  { %556 = vmatpush.bf16.xpose.msra.mxu2 %v547_v12 }
 0x341   :  { %v537_v13 = vpop.permute.xlu2 %536 }
 0x342   :  { %1928 = vmatmul.msk.bf16.vlgmr.msra.gmra.mxu2 %vm400_vm0, %v537_v13 }
 0x349   :  { %v566_v56 = vpop.permute.xlu2 %565 }
 0x360   :  { %v416_v16 = vpop.f32.mrf.mxu1 }
 0x361   :  { %v441_v17 = vsel %vm2579_vm3, -1e+30, %v416_v16 }
 0x362   :  { %v444_v18 = vsel %vm443_vm4, %v441_v17, -inf }
 0x363   :  { %445 = vmax.xlane.f32.xlu0 %v444_v18 }
 0x368   :  { %v418_v21 = vpop.f32.mrf.mxu1 }
 0x36e   :  { %v435_v22 = vpop.f32.mrf.mxu2 }
 0x36f   :  { %v442_v35 = vsel %vm2579_vm3, -1e+30, %v435_v22 }
 0x370   :  { %v447_v36 = vsel %vm443_vm4, %v442_v35, -inf }
 0x376   :  { %v437_v23 = vpop.f32.mrf.mxu2 }
 0x3c5   :  { %v558_v24 = vpop.f32.mrf.mxu2 }
 0x3c6   :  { %v591_v19 = vsel %vm2579_vm3, -1e+30, %v558_v24 }
 0x3c7   :  { %v593_v20 = vsel %vm443_vm4, %v591_v19, -inf }
 0x3c8   :  { %594 = vmax.xlane.f32.xlu2 %v593_v20 }
 0x3cd   :  { %v560_v25 = vpop.f32.mrf.mxu2 }
 0x3d6   :  { %v446_v27 = vpop.xlane.xlu0 %445 }
 0x3d7   :  { %v450_v28 = vsub.f32 %v441_v17, %v446_v27 }
 0x3d9   :  { %v452_v29 = vmul.f32 1.442695, %v450_v28 }
 0x3db   :  { %2191 = vpow2.f32 %v452_v29 }
 0x3e1   :  { %v2192_v31 = vpop.eup %2191 }
 0x3e2   :  { %v456_v32 = vsel %vm443_vm4, %v2192_v31, 0.0 }
 0x3e3   :  { %457 = vadd.xlane.f32.xlu1 %v456_v32 }
 0x3fc   :  { %570 = vrot.lane.b32.xlu1 %v569_v34, %s2324_s0 }
 0x426   :  { %448 = vmax.xlane.f32.xlu1 %v447_v36 }
 0x43b   :  { %v595_v0 = vpop.xlane.xlu2 %594 }
 0x43c   :  { %v599_v2 = vsub.f32 %v591_v19, %v595_v0 }
 0x43e   :  { %v601_v5 = vmul.f32 1.442695, %v599_v2  ;;  %v2085_v2 = vld [vmem:[%s2377_s8 + $0x8] sm:$0xff] }
 0x43f   :  { %670 = vrot.lane.b32.xlu1 %v669_v39, %s2324_s0  ;;  %731 = vmatpush.bf16.msrb.mxu2 %v2085_v2 }
 0x456   :  { %v458_v40 = vpop.xlane.xlu1 %457 }
 0x457   :  { %2193 = vrcp.f32 %v458_v40  ;;  %v473_v45 = vand.u32 2147483648, %v458_v40  ;;  %v471_v48 = vand.u32 2147483647, %v458_v40  ;;  %vm467_vm6 = vweird.f32 %v458_v40 }
 0x459   :  { %v474_v50 = vor.u32 1.1754944e-38, %v473_v45  ;;  %vm472_vm8 = vcmp.eq.f32.partialorder %v471_v48, 8.507059e+37 }
 0x45d   :  { %v2194_v42 = vpop.eup %2193 }
 0x45e   :  { %v463_v43 = vmul.f32 %v2194_v42, %v458_v40  ;;  %vm468_vm5 = vweird.f32 %v2194_v42 }
 0x45f   :  { %vm469_vm7 = vmor %vm467_vm6, %vm468_vm5 }
 0x460   :  { %v464_v44 = vsub.f32 1.0, %v463_v43 }
 0x462   :  { %v465_v47 = vmul.f32 %v2194_v42, %v464_v44 }
 0x464   :  { %v466_v49 = vadd.f32 %v2194_v42, %v465_v47 }
 0x466   :  { %v470_v51 = vsel %vm469_vm7, %v2194_v42, %v466_v49 }
 0x467   :  { %v475_v52 = vsel %vm472_vm8, %v474_v50, %v470_v51 }
 0x468   :  { %v476_v41 = vmul.f32 %v2192_v31, %v475_v52  ;;  %v644_v31 = vunpack.c.l.b16 %v2563_v46 }
 0x46a   :  { %v492_v53 = vpack.c.bf16 %v476_v41, %v476_v41  ;;  %v645_v33 = vpack.c.b16 %v644_v31, %v644_v31 }
 0x46c   :  { %1926 = vmatmul.msk.bf16.vlgmr.msrb.gmra.mxu3 %vm443_vm4, %v492_v53 }
 0x46e   :  { %v571_v54 = vpop.permute.xlu1 %570 }
 0x46f   :  { %v576_v55 = vsel %vm400_vm0, %v571_v54, 0 }
 0x470   :  { %585 = vmatpush.bf16.xpose.msra.mxu3 %v576_v55 }
 0x47c   :  { %1929 = vmatmul.msk.bf16.vlgmr.msra.gmra.mxu3 %vm400_vm0, %v566_v56 }
 0x499   :  { %v449_v57 = vpop.xlane.xlu1 %448 }
 0x49a   :  { %v451_v62 = vsub.f32 %v442_v35, %v449_v57 }
 0x49c   :  { %v454_v63 = vmul.f32 1.442695, %v451_v62 }
 0x49e   :  { %2195 = vpow2.f32 %v454_v63 }
 0x49f   :  { %2197 = vpow2.f32 %v601_v5 }
 0x4a4   :  { %v2196_v6 = vpop.eup %2195 }
 0x4a5   :  { %v459_v8 = vsel %vm443_vm4, %v2196_v6, 0.0  ;;  %v2605_v9 = vpop.eup %2197 }
 0x4a6   :  { %v605_v10 = vsel %vm443_vm4, %v2605_v9, 0.0 }
 0x4b1   :  { %v671_v58 = vpop.permute.xlu1 %670 }
 0x4b2   :  { %v676_v59 = vsel %vm497_vm1, %v671_v58, 0 }
 0x4b3   :  { %685 = vmatpush.bf16.msrb.mxu1 %v676_v59 }
 0x4ef   :  { %v2599_v60 = vpop.f32.mrf.mxu3 }
 0x4f7   :  { %v512_v61 = vpop.f32.mrf.mxu3 }
 0x4ff   :  { %v587_v1 = vpop.f32.mrf.mxu3 }
 0x500   :  { %v592_v3 = vsel %vm2579_vm3, -1e+30, %v587_v1 }
 0x501   :  { %v596_v4 = vsel %vm443_vm4, %v592_v3, -inf }
 0x502   :  { %597 = vmax.xlane.f32.xlu0 %v596_v4 }
 0x507   :  { %v589_v7 = vpop.f32.mrf.mxu3 }
 0x50a   :  { %460 = vadd.xlane.f32.xlu0 %v459_v8  ;;  %v2084_v8 = vld [vmem:[%s2377_s8] sm:$0xff]  ;;  %s2870_s8 = sld [smem:[#allocation12_spill]] }
 0x50b   :  { %732 = vmatpush.bf16.msrb.mxu2 %v2084_v8 }
 0x512   :  { %606 = vadd.xlane.f32.xlu0 %v605_v10 }
 0x575   :  { %v598_v11 = vpop.xlane.xlu0 %597 }
 0x576   :  { %v600_v12 = vsub.f32 %v592_v3, %v598_v11 }
 0x578   :  { %v603_v13 = vmul.f32 1.442695, %v600_v12 }
 0x57a   :  { %2199 = vpow2.f32 %v603_v13 }
 0x57d   :  { %v461_v14 = vpop.xlane.xlu0 %460 }
 0x57e   :  { %2201 = vrcp.f32 %v461_v14  ;;  %v488_v23 = vand.u32 2147483648, %v461_v14  ;;  %v486_v19 = vand.u32 2147483647, %v461_v14  ;;  %vm482_vm10 = vweird.f32 %v461_v14 }
 0x580   :  { %v2200_v16 = vpop.eup %2199  ;;  %v489_v25 = vor.u32 1.1754944e-38, %v488_v23  ;;  %vm487_vm12 = vcmp.eq.f32.partialorder %v486_v19, 8.507059e+37 }
 0x581   :  { %v608_v17 = vsel %vm443_vm4, %v2200_v16, 0.0 }
 0x582   :  { %609 = vadd.xlane.f32.xlu0 %v608_v17 }
 0x584   :  { %v2202_v18 = vpop.eup %2201 }
 0x585   :  { %v478_v21 = vmul.f32 %v2202_v18, %v461_v14  ;;  %vm483_vm9 = vweird.f32 %v2202_v18  ;;  %v607_v34 = vpop.xlane.xlu0 %606 }
 0x586   :  { %vm484_vm11 = vmor %vm482_vm10, %vm483_vm9  ;;  %2203 = vrcp.f32 %v607_v34  ;;  %v622_v45 = vand.u32 2147483648, %v607_v34  ;;  %vm616_vm14 = vweird.f32 %v607_v34  ;;  %v620_v46 = vand.u32 2147483647, %v607_v34 }
 0x587   :  { %v479_v22 = vsub.f32 1.0, %v478_v21 }
 0x588   :  { %v623_v52 = vor.u32 1.1754944e-38, %v622_v45  ;;  %vm621_vm6 = vcmp.eq.f32.partialorder %v620_v46, 8.507059e+37 }
 0x589   :  { %v480_v24 = vmul.f32 %v2202_v18, %v479_v22 }
 0x58b   :  { %v481_v20 = vadd.f32 %v2202_v18, %v480_v24 }
 0x58c   :  { %v2204_v35 = vpop.eup %2203 }
 0x58d   :  { %v485_v27 = vsel %vm484_vm11, %v2202_v18, %v481_v20  ;;  %v612_v36 = vmul.f32 %v2204_v35, %v607_v34  ;;  %vm617_vm13 = vweird.f32 %v2204_v35 }
 0x58e   :  { %v490_v28 = vsel %vm487_vm12, %v489_v25, %v485_v27  ;;  %vm618_vm15 = vmor %vm616_vm14, %vm617_vm13 }
 0x58f   :  { %v491_v29 = vmul.f32 %v2196_v6, %v490_v28  ;;  %v613_v37 = vsub.f32 1.0, %v612_v36  ;;  %v2087_v36 = vld [vmem:[%s2397_s30 + $0x8] sm:$0xff] }
 0x590   :  { %859 = vmatpush.bf16.msrb.mxu3 %v2087_v36  ;;  %v2090_v36 = vld [vmem:[%s2407_s12 + $0x10] sm:$0xff] }
 0x591   :  { %v493_v32 = vpack.c.bf16 %v491_v29, %v491_v29  ;;  %v614_v40 = vmul.f32 %v2204_v35, %v613_v37 }
 0x593   :  { %1927 = vmatmul.msk.bf16.vlgmr.msra.gmra.mxu1 %vm443_vm4, %v493_v32  ;;  %v615_v43 = vadd.f32 %v2204_v35, %v614_v40 }
 0x595   :  { %v619_v51 = vsel %vm618_vm15, %v2204_v35, %v615_v43 }
 0x596   :  { %646 = vrot.lane.b32.xlu0 %v645_v33, %s2324_s0  ;;  %v624_v54 = vsel %vm621_vm6, %v623_v52, %v619_v51 }
 0x597   :  { %v625_v58 = vmul.f32 %v2605_v9, %v624_v54 }
 0x599   :  { %v641_v63 = vpack.c.bf16 %v625_v58, %v625_v58 }
 0x5f5   :  { %v610_v39 = vpop.xlane.xlu0 %609 }
 0x5f6   :  { %2205 = vrcp.f32 %v610_v39  ;;  %v637_v48 = vand.u32 2147483648, %v610_v39  ;;  %v635_v50 = vand.u32 2147483647, %v610_v39  ;;  %vm631_vm7 = vweird.f32 %v610_v39 }
 0x5f8   :  { %v638_v53 = vor.u32 1.1754944e-38, %v637_v48  ;;  %vm636_vm9 = vcmp.eq.f32.partialorder %v635_v50, 8.507059e+37 }
 0x5fc   :  { %v2206_v42 = vpop.eup %2205 }
 0x5fd   :  { %v627_v44 = vmul.f32 %v2206_v42, %v610_v39  ;;  %vm632_vm5 = vweird.f32 %v2206_v42  ;;  %v2086_v39 = vld [vmem:[%s2397_s30] sm:$0xff]  ;;  %s2874_s30 = sld [smem:[#allocation15_spill]] }
 0x5fe   :  { %vm633_vm8 = vmor %vm631_vm7, %vm632_vm5  ;;  %860 = vmatpush.bf16.msrb.mxu3 %v2086_v39  ;;  %v2088_v39 = vld [vmem:[%s2407_s12] sm:$0xff] }
 0x5ff   :  { %v628_v47 = vsub.f32 1.0, %v627_v44 }
 0x601   :  { %v629_v49 = vmul.f32 %v2206_v42, %v628_v47 }
 0x603   :  { %v630_v41 = vadd.f32 %v2206_v42, %v629_v49 }
 0x605   :  { %v634_v55 = vsel %vm633_vm8, %v2206_v42, %v630_v41 }
 0x606   :  { %v639_v56 = vsel %vm636_vm9, %v638_v53, %v634_v55 }
 0x607   :  { %v640_v57 = vmul.f32 %v2200_v16, %v639_v56  ;;  %v2167_v16 = vld [vmem:[%s2382_s14] ss:$0 sm:$0xff]  ;;  %s2871_s14 = sld [smem:[#allocation13_spill]] }
 0x608   :  { %v647_v59 = vpop.permute.xlu0 %646 }
 0x609   :  { %v652_v61 = vsel %vm497_vm1, %v647_v59, 0  ;;  %v642_v62 = vpack.c.bf16 %v640_v57, %v640_v57 }
 0x60a   :  { %661 = vmatpush.bf16.msrb.mxu0 %v652_v61 }
 0x60b   :  { %1931 = vmatmul.msk.bf16.vlgmr.msrb.gmra.mxu1 %vm443_vm4, %v642_v62 }
 0x60d   :  { %1930 = vmatmul.msk.bf16.vlgmr.msrb.gmra.mxu0 %vm443_vm4, %v641_v63 }
 0x610   :  { %v529_v0 = vpop.f32.mrf.mxu1 }
 0x618   :  { %v531_v1 = vpop.f32.mrf.mxu1 }
 0x688   :  { %v687_v3 = vpop.f32.mrf.mxu1 }
 0x68a   :  { %v663_v4 = vpop.f32.mrf.mxu0 }
 0x68b   :  { %v2155_v5 = vpack.i.bf16 %v687_v3, %v663_v4 }
 0x68d   :  { %2156 = vrot.lane.b32.xlu2 %v2155_v5, %s2325_s5 }
 0x690   :  { %v689_v6 = vpop.f32.mrf.mxu1 }
 0x692   :  { %v665_v7 = vpop.f32.mrf.mxu0 }
 0x6e7   :  { %v2157_v9 = vpop.permute.xlu2 %2156 }
 0x6e8   :  { %v2159_v10 = vunpack.i.h.bf16 %v2157_v9  ;;  %v2158_v11 = vunpack.i.l.bf16 %v2157_v9 }
 0x6ea   :  { %v700_v12 = vsel %vm400_vm0, %v529_v0, %v2159_v10  ;;  %v699_v13 = vsel %vm400_vm0, %v2599_v60, %v2158_v11 }
 0x6eb   :  { %v705_v14 = vpack.c.bf16 %v700_v12, %v699_v13 }
 0x6ed   :  { %1940 = vmatmul.msk.bf16.vlgmr.msrb.gmra.mxu2 %vm204_vm2, %v705_v14 }
 0x770   :  { %v734_v17 = vpop.f32.mrf.mxu2 }
 0x771   :  { %v735_v18 = vadd.f32 %v2167_v16, %v734_v17 }
 0x773   :  { %v2626_v21 = vadd.f32 %v735_v18, %v2523_v26 }
 0x775   :  { %v743_v22 = vsel %vm204_vm2, %v2626_v21, 0.0 }
 0x776   :  { %744 = vadd.xlane.f32.xlu0 %v743_v22  ;;  %v2168_v22 = vld [vmem:[%s2387_s19] ss:$0 sm:$0xff]  ;;  %s2872_s19 = sld [smem:[#allocation16_spill]] }
 0x778   :  { %v736_v23 = vpop.f32.mrf.mxu2 }
 0x779   :  { %v737_v24 = vadd.f32 %v2167_v16, %v736_v23 }
 0x77b   :  { %v2631_v19 = vadd.f32 %v737_v24, %v2528_v30 }
 0x77d   :  { %v746_v60 = vsel %vm204_vm2, %v2631_v19, 0.0 }
 0x77e   :  { %747 = vadd.xlane.f32.xlu1 %v746_v60 }
 0x7e9   :  { %v745_v20 = vpop.xlane.xlu0 %744 }
 0x7ea   :  { %v749_v25 = vmul.f32 %v745_v20, %v2532_v38 }
 0x7ec   :  { %v2637_v26 = vsub.f32 %v2626_v21, %v749_v25 }
 0x7ee   :  { %v753_v27 = vmul.f32 %v2637_v26, %v2637_v26 }
 0x7f0   :  { %v755_v28 = vsel %vm204_vm2, %v753_v27, 0.0  ;;  %v2169_v27 = vld [vmem:[%s2392_s24] ss:$0 sm:$0xff]  ;;  %s2873_s24 = sld [smem:[#allocation14_spill]] }
 0x7f1   :  { %v748_v29 = vpop.xlane.xlu1 %747  ;;  %756 = vadd.xlane.f32.xlu2 %v755_v28 }
 0x7f2   :  { %v750_v30 = vmul.f32 %v748_v29, %v2532_v38 }
 0x7f4   :  { %v2644_v31 = vsub.f32 %v2631_v19, %v750_v30 }
 0x7f6   :  { %v754_v32 = vmul.f32 %v2644_v31, %v2644_v31 }
 0x7f8   :  { %v758_v33 = vsel %vm204_vm2, %v754_v32, 0.0  ;;  %v2095_v32 = vld [vmem:[%s2407_s12 + $0x38] sm:$0xff] }
 0x7f9   :  { %759 = vadd.xlane.f32.xlu0 %v758_v33  ;;  %954 = vmatpush.bf16.msra.mxu0 %v2095_v32  ;;  %v2094_v33 = vld [vmem:[%s2407_s12 + $0x30] sm:$0xff] }
 0x7fd   :  { %955 = vmatpush.bf16.msra.mxu0 %v2094_v33 }
 0x864   :  { %v757_v34 = vpop.xlane.xlu2 %756 }
 0x865   :  { %v761_v35 = vmul.f32 %v757_v34, %v2532_v38  ;;  %v2093_v34 = vld [vmem:[%s2407_s12 + $0x28] sm:$0xff] }
 0x866   :  { %956 = vmatpush.bf16.msra.mxu0 %v2093_v34 }
 0x867   :  { %v763_v37 = vadd.f32 1e-05, %v761_v35  ;;  %v2091_v35 = vld [vmem:[%s2407_s12 + $0x18] sm:$0xff] }
 0x869   :  { %2207 = vrsqrt.f32 %v763_v37  ;;  %vm772_vm10 = vcmp.eq.f32.partialorder %v763_v37, inf  ;;  %v775_v53 = vand.u32 2147483648, %v763_v37  ;;  %vm774_vm11 = vcmp.eq.f32.partialorder %v763_v37, 0.0 }
 0x86c   :  { %v760_v40 = vpop.xlane.xlu0 %759 }
 0x86d   :  { %v762_v42 = vmul.f32 %v760_v40, %v2532_v38  ;;  %v2170_v40 = vld [vmem:[%s2863_s9] ss:$0 sm:$0xff] }
 0x86f   :  { %v2208_v43 = vpop.eup %2207  ;;  %v764_v44 = vadd.f32 1e-05, %v762_v42 }
 0x870   :  { %v766_v45 = vmul.f32 %v2208_v43, %v763_v37 }
 0x871   :  { %2209 = vrsqrt.f32 %v764_v44  ;;  %vm784_vm12 = vcmp.eq.f32.partialorder %v764_v44, inf  ;;  %v787_v61 = vand.u32 2147483648, %v764_v44  ;;  %vm786_vm13 = vcmp.eq.f32.partialorder %v764_v44, 0.0 }
 0x872   :  { %v767_v46 = vmul.f32 %v2208_v43, %v766_v45 }
 0x874   :  { %v768_v47 = vmul.f32 0.5, %v767_v46 }
 0x876   :  { %v769_v48 = vsub.f32 1.5, %v768_v47 }
 0x877   :  { %v2210_v49 = vpop.eup %2209 }
 0x878   :  { %v770_v50 = vmul.f32 %v2208_v43, %v769_v48  ;;  %v778_v51 = vmul.f32 %v2210_v49, %v764_v44 }
 0x87a   :  { %v771_v52 = vmul.f32 %v770_v50, %v763_v37  ;;  %v779_v41 = vmul.f32 %v2210_v49, %v778_v51 }
 0x87c   :  { %v773_v54 = vsel %vm772_vm10, %v763_v37, %v771_v52  ;;  %v780_v55 = vmul.f32 0.5, %v779_v41  ;;  %v2089_v37 = vld [vmem:[%s2407_s12 + $0x8] sm:$0xff] }
 0x87d   :  { %v776_v56 = vsel %vm774_vm11, %v775_v53, %v773_v54 }
 0x87e   :  { %2211 = vrcp.f32 %v776_v56  ;;  %v781_v57 = vsub.f32 1.5, %v780_v55  ;;  %v800_v4 = vand.u32 2147483648, %v776_v56  ;;  %vm794_vm15 = vweird.f32 %v776_v56 }
 0x87f   :  { %v798_v6 = vand.u32 2147483647, %v776_v56 }
 0x880   :  { %v782_v58 = vmul.f32 %v2210_v49, %v781_v57  ;;  %v801_v10 = vor.u32 1.1754944e-38, %v800_v4 }
 0x881   :  { %vm799_vm6 = vcmp.eq.f32.partialorder %v798_v6, 8.507059e+37 }
 0x882   :  { %v783_v59 = vmul.f32 %v782_v58, %v764_v44 }
 0x884   :  { %v2212_v62 = vpop.eup %2211  ;;  %v785_v63 = vsel %vm784_vm12, %v764_v44, %v783_v59 }
 0x885   :  { %v788_v0 = vsel %vm786_vm13, %v787_v61, %v785_v63  ;;  %v790_v1 = vmul.f32 %v2212_v62, %v776_v56  ;;  %vm795_vm14 = vweird.f32 %v2212_v62 }
 0x886   :  { %2213 = vrcp.f32 %v788_v0  ;;  %vm796_vm5 = vmor %vm794_vm15, %vm795_vm14  ;;  %v815_v13 = vand.u32 2147483648, %v788_v0  ;;  %v813_v16 = vand.u32 2147483647, %v788_v0  ;;  %vm809_vm8 = vweird.f32 %v788_v0 }
 0x887   :  { %v791_v2 = vsub.f32 1.0, %v790_v1  ;;  %v2171_v1 = vld [vmem:[%s2864_s13] ss:$0 sm:$0xff] }
 0x888   :  { %v816_v23 = vor.u32 1.1754944e-38, %v815_v13  ;;  %vm814_vm10 = vcmp.eq.f32.partialorder %v813_v16, 8.507059e+37 }
 0x889   :  { %v792_v3 = vmul.f32 %v2212_v62, %v791_v2 }
 0x88b   :  { %v793_v5 = vadd.f32 %v2212_v62, %v792_v3 }
 0x88c   :  { %v2214_v7 = vpop.eup %2213 }
 0x88d   :  { %v797_v8 = vsel %vm796_vm5, %v2212_v62, %v793_v5  ;;  %v805_v9 = vmul.f32 %v2214_v7, %v788_v0  ;;  %vm810_vm7 = vweird.f32 %v2214_v7 }
 0x88e   :  { %v802_v12 = vsel %vm799_vm6, %v801_v10, %v797_v8  ;;  %vm811_vm9 = vmor %vm809_vm8, %vm810_vm7 }
 0x88f   :  { %v806_v11 = vsub.f32 1.0, %v805_v9  ;;  %v803_v17 = vmul.f32 %v802_v12, %v2637_v26 }
 0x891   :  { %v807_v14 = vmul.f32 %v2214_v7, %v806_v11  ;;  %v822_v25 = vmul.f32 %v2168_v22, %v803_v17 }
 0x893   :  { %v808_v18 = vadd.f32 %v2214_v7, %v807_v14  ;;  %v827_v26 = vadd.f32 %v2169_v27, %v822_v25 }
 0x895   :  { %v812_v24 = vsel %vm811_vm9, %v2214_v7, %v808_v18 }
 0x896   :  { %v817_v60 = vsel %vm814_vm10, %v816_v23, %v812_v24  ;;  %v2097_v24 = vld [vmem:[%s2865_s17 + $0x8] sm:$0xff] }
 0x897   :  { %v818_v20 = vmul.f32 %v817_v60, %v2644_v31  ;;  %v2092_v31 = vld [vmem:[%s2407_s12 + $0x20] sm:$0xff]  ;;  %v2099_v60 = vld [vmem:[%s2866_s21 + $0x8] sm:$0xff]  ;;  %1084 = vmatpush.bf16.msra.mxu1 %v2097_v24  ;;  %s2875_s12 = sld [smem:[#allocation18_spill]] }
 0x898   :  { %957 = vmatpush.bf16.msra.mxu0 %v2092_v31  ;;  %1116 = vmatpush.bf16.msra.mxu2 %v2099_v60 }
 0x899   :  { %v823_v28 = vmul.f32 %v2168_v22, %v818_v20  ;;  %v2101_v20 = vld [vmem:[%s2867_s25 + $0x8] sm:$0xff] }
 0x89a   :  { %1146 = vmatpush.bf16.msra.mxu3 %v2101_v20 }
 0x89b   :  { %v828_v29 = vadd.f32 %v2169_v27, %v823_v28  ;;  %v2096_v27 = vld [vmem:[%s2865_s17] sm:$0xff] }
 0x89c   :  { %958 = vmatpush.bf16.msra.mxu0 %v2091_v35  ;;  %v2098_v28 = vld [vmem:[%s2866_s21] sm:$0xff]  ;;  %1085 = vmatpush.bf16.msra.mxu1 %v2096_v27 }
 0x89d   :  { %v833_v30 = vpack.c.bf16 %v828_v29, %v827_v26  ;;  %v2100_v26 = vld [vmem:[%s2867_s25] sm:$0xff]  ;;  %1117 = vmatpush.bf16.msra.mxu2 %v2098_v28 }
 0x89e   :  { %1147 = vmatpush.bf16.msra.mxu3 %v2100_v26 }
 0x89f   :  { %1949 = vmatmul.msk.bf16.vlgmr.msrb.gmra.mxu3 %vm204_vm2, %v833_v30 }
 0x8a0   :  { %959 = vmatpush.bf16.msra.mxu0 %v2090_v36 }
 0x8a4   :  { %960 = vmatpush.bf16.msra.mxu0 %v2089_v37 }
 0x8a8   :  { %961 = vmatpush.bf16.msra.mxu0 %v2088_v39 }
 0x922   :  { %v862_v42 = vpop.f32.mrf.mxu3 }
 0x923   :  { %v863_v43 = vadd.f32 %v2170_v40, %v862_v42 }
 0x925   :  { %v869_v44 = vmul.f32 %v863_v43, %v863_v43  ;;  %v867_v58 = vmul.f32 0.5, %v863_v43 }
 0x927   :  { %v871_v45 = vmul.f32 %v869_v44, %v863_v43 }
 0x929   :  { %v873_v46 = vmul.f32 0.044715, %v871_v45 }
 0x92a   :  { %v864_v47 = vpop.f32.mrf.mxu3 }
 0x92b   :  { %v875_v48 = vadd.f32 %v873_v46, %v863_v43  ;;  %v865_v49 = vadd.f32 %v2170_v40, %v864_v47 }
 0x92d   :  { %v870_v50 = vmul.f32 %v865_v49, %v865_v49  ;;  %v877_v51 = vmul.f32 0.7978846, %v875_v48  ;;  %v868_v59 = vmul.f32 0.5, %v865_v49 }
 0x92f   :  { %v872_v52 = vmul.f32 %v870_v50, %v865_v49  ;;  %2215 = vtanh.f32 %v877_v51 }
 0x931   :  { %v874_v41 = vmul.f32 0.044715, %v872_v52 }
 0x933   :  { %v876_v53 = vadd.f32 %v874_v41, %v865_v49 }
 0x935   :  { %v878_v54 = vmul.f32 0.7978846, %v876_v53  ;;  %v2216_v55 = vpop.eup %2215 }
 0x936   :  { %v881_v56 = vadd.f32 1.0, %v2216_v55 }
 0x937   :  { %2217 = vtanh.f32 %v878_v54 }
 0x938   :  { %v883_v62 = vmul.f32 %v881_v56, %v867_v58 }
 0x93d   :  { %v2218_v57 = vpop.eup %2217 }
 0x93e   :  { %v882_v61 = vadd.f32 1.0, %v2218_v57 }
 0x940   :  { %v884_v63 = vmul.f32 %v882_v61, %v868_v59 }
 0x942   :  { %v901_v0 = vpack.c.bf16 %v884_v63, %v883_v62 }
 0x944   :  { %962 = vmatmul.bf16.vlgmr.msra.gmra.mxu0 %v901_v0 }
 0x9c1   :  { %v963_v2 = vpop.f32.mrf.mxu0 }
 0x9c2   :  { %v964_v3 = vadd.f32 %v2171_v1, %v963_v2 }
 0x9c4   :  { %v2669_v4 = vadd.f32 %v964_v3, %v2626_v21 }
 0x9c6   :  { %v972_v5 = vsel %vm204_vm2, %v2669_v4, 0.0 }
 0x9c7   :  { %973 = vadd.xlane.f32.xlu1 %v972_v5 }
 0x9c9   :  { %v965_v6 = vpop.f32.mrf.mxu0 }
 0x9ca   :  { %v966_v7 = vadd.f32 %v2171_v1, %v965_v6 }
 0x9cc   :  { %v2674_v8 = vadd.f32 %v966_v7, %v2631_v19 }
 0x9ce   :  { %v975_v9 = vsel %vm204_vm2, %v2674_v8, 0.0 }
 0x9cf   :  { %976 = vadd.xlane.f32.xlu0 %v975_v9 }
 0xa3a   :  { %v974_v10 = vpop.xlane.xlu1 %973 }
 0xa3b   :  { %v978_v21 = vmul.f32 %v974_v10, %v2532_v38  ;;  %v2172_v10 = vld [vmem:[%s2868_s29] ss:$0 sm:$0xff] }
 0xa3d   :  { %v2680_v11 = vsub.f32 %v2669_v4, %v978_v21 }
 0xa3f   :  { %v982_v12 = vmul.f32 %v2680_v11, %v2680_v11 }
 0xa41   :  { %v984_v13 = vsel %vm204_vm2, %v982_v12, 0.0 }
 0xa42   :  { %v977_v19 = vpop.xlane.xlu0 %976  ;;  %985 = vadd.xlane.f32.xlu2 %v984_v13 }
 0xa43   :  { %v979_v14 = vmul.f32 %v977_v19, %v2532_v38 }
 0xa45   :  { %v2687_v16 = vsub.f32 %v2674_v8, %v979_v14 }
 0xa47   :  { %v983_v17 = vmul.f32 %v2687_v16, %v2687_v16 }
 0xa49   :  { %v987_v18 = vsel %vm204_vm2, %v983_v17, 0.0  ;;  %v2173_v17 = vld [vmem:[%s2869_s3] ss:$0 sm:$0xff] }
 0xa4a   :  { %988 = vadd.xlane.f32.xlu1 %v987_v18 }
 0xab5   :  { %v986_v22 = vpop.xlane.xlu2 %985 }
 0xab6   :  { %v990_v23 = vmul.f32 %v986_v22, %v2532_v38 }
 0xab8   :  { %v992_v25 = vadd.f32 1e-05, %v990_v23 }
 0xaba   :  { %2219 = vrsqrt.f32 %v992_v25  ;;  %vm1001_vm11 = vcmp.eq.f32.partialorder %v992_v25, inf  ;;  %v1004_v44 = vand.u32 2147483648, %v992_v25  ;;  %vm1003_vm12 = vcmp.eq.f32.partialorder %v992_v25, 0.0 }
 0xabd   :  { %v989_v29 = vpop.xlane.xlu1 %988 }
 0xabe   :  { %v991_v30 = vmul.f32 %v989_v29, %v2532_v38 }
 0xac0   :  { %v2220_v32 = vpop.eup %2219  ;;  %v993_v33 = vadd.f32 1e-05, %v991_v30 }
 0xac1   :  { %v995_v34 = vmul.f32 %v2220_v32, %v992_v25 }
 0xac2   :  { %2221 = vrsqrt.f32 %v993_v33  ;;  %vm1013_vm13 = vcmp.eq.f32.partialorder %v993_v33, inf  ;;  %v1016_v51 = vand.u32 2147483648, %v993_v33  ;;  %vm1015_vm14 = vcmp.eq.f32.partialorder %v993_v33, 0.0 }
 0xac3   :  { %v996_v31 = vmul.f32 %v2220_v32, %v995_v34 }
 0xac5   :  { %v997_v35 = vmul.f32 0.5, %v996_v31 }
 0xac7   :  { %v998_v36 = vsub.f32 1.5, %v997_v35 }
 0xac8   :  { %v2222_v37 = vpop.eup %2221 }
 0xac9   :  { %v999_v39 = vmul.f32 %v2220_v32, %v998_v36  ;;  %v1007_v40 = vmul.f32 %v2222_v37, %v993_v33 }
 0xacb   :  { %v1000_v42 = vmul.f32 %v999_v39, %v992_v25  ;;  %v1008_v43 = vmul.f32 %v2222_v37, %v1007_v40 }
 0xacd   :  { %v1002_v45 = vsel %vm1001_vm11, %v992_v25, %v1000_v42  ;;  %v1009_v46 = vmul.f32 0.5, %v1008_v43 }
 0xace   :  { %v1005_v47 = vsel %vm1003_vm12, %v1004_v44, %v1002_v45 }
 0xacf   :  { %2223 = vrcp.f32 %v1005_v47  ;;  %v1010_v48 = vsub.f32 1.5, %v1009_v46  ;;  %v1029_v57 = vand.u32 2147483648, %v1005_v47  ;;  %vm1023_vm5 = vweird.f32 %v1005_v47 }
 0xad0   :  { %v1027_v59 = vand.u32 2147483647, %v1005_v47 }
 0xad1   :  { %v1011_v49 = vmul.f32 %v2222_v37, %v1010_v48  ;;  %v1030_v0 = vor.u32 1.1754944e-38, %v1029_v57 }
 0xad2   :  { %vm1028_vm7 = vcmp.eq.f32.partialorder %v1027_v59, 8.507059e+37 }
 0xad3   :  { %v1012_v50 = vmul.f32 %v1011_v49, %v993_v33 }
 0xad5   :  { %v2224_v52 = vpop.eup %2223  ;;  %v1014_v41 = vsel %vm1013_vm13, %v993_v33, %v1012_v50 }
 0xad6   :  { %v1017_v53 = vsel %vm1015_vm14, %v1016_v51, %v1014_v41  ;;  %v1019_v54 = vmul.f32 %v2224_v52, %v1005_v47  ;;  %vm1024_vm15 = vweird.f32 %v2224_v52 }
 0xad7   :  { %2225 = vrcp.f32 %v1017_v53  ;;  %vm1025_vm6 = vmor %vm1023_vm5, %vm1024_vm15  ;;  %v1044_v3 = vand.u32 2147483648, %v1017_v53  ;;  %v1042_v6 = vand.u32 2147483647, %v1017_v53  ;;  %vm1038_vm9 = vweird.f32 %v1017_v53 }
 0xad8   :  { %v1020_v55 = vsub.f32 1.0, %v1019_v54 }
 0xad9   :  { %v1045_v21 = vor.u32 1.1754944e-38, %v1044_v3  ;;  %vm1043_vm11 = vcmp.eq.f32.partialorder %v1042_v6, 8.507059e+37 }
 0xada   :  { %v1021_v56 = vmul.f32 %v2224_v52, %v1020_v55 }
 0xadc   :  { %v1022_v58 = vadd.f32 %v2224_v52, %v1021_v56 }
 0xadd   :  { %v2226_v61 = vpop.eup %2225 }
 0xade   :  { %v1026_v62 = vsel %vm1025_vm6, %v2224_v52, %v1022_v58  ;;  %v1034_v63 = vmul.f32 %v2226_v61, %v1017_v53  ;;  %vm1039_vm8 = vweird.f32 %v2226_v61 }
 0xadf   :  { %v1031_v2 = vsel %vm1028_vm7, %v1030_v0, %v1026_v62  ;;  %vm1040_vm10 = vmor %vm1038_vm9, %vm1039_vm8 }
 0xae0   :  { %v1035_v1 = vsub.f32 1.0, %v1034_v63  ;;  %v1032_v7 = vmul.f32 %v1031_v2, %v2680_v11 }
 0xae2   :  { %v1036_v5 = vmul.f32 %v2226_v61, %v1035_v1  ;;  %v1051_v14 = vmul.f32 %v2172_v10, %v1032_v7 }
 0xae4   :  { %v1037_v9 = vadd.f32 %v2226_v61, %v1036_v5  ;;  %v1056_v22 = vadd.f32 %v2173_v17, %v1051_v14 }
 0xae6   :  { %v1041_v12 = vsel %vm1040_vm10, %v2226_v61, %v1037_v9 }
 0xae7   :  { %v1046_v13 = vsel %vm1043_vm11, %v1045_v21, %v1041_v12 }
 0xae8   :  { %v1047_v19 = vmul.f32 %v1046_v13, %v2687_v16 }
 0xaea   :  { %v1052_v18 = vmul.f32 %v2172_v10, %v1047_v19 }
 0xaec   :  { %v1057_v23 = vadd.f32 %v2173_v17, %v1052_v18 }
 0xaee   :  { %v1062_v24 = vpack.c.bf16 %v1057_v23, %v1056_v22 }
 0xaf0   :  { %1990 = vmatmul.msk.bf16.vlgmr.msra.gmra.mxu1 %vm204_vm2, %v1062_v24  ;;  %1999 = vmatmul.msk.bf16.vlgmr.msra.gmra.mxu2 %vm204_vm2, %v1062_v24 }
 0xaf1   :  { %2008 = vmatmul.msk.bf16.vlgmr.msra.gmra.mxu3 %vm204_vm2, %v1062_v24 }
 0xb6d   :  { %v1087_v11 = vpop.f32.mrf.mxu1 }
 0xb6e   :  { %v1092_v60 = vmul.f32 0.25, %v1087_v11 }
 0xb70   :  { %v1154_v20 = vpack.c.bf16 %v1092_v60, %v1092_v60 }
 0xb72   :  { %v1289_v25 = vunpack.c.l.b16 %v1154_v20 }
 0xb73   :  { %v1119_v27 = vpop.f32.mrf.mxu2 }
 0xb74   :  { %v1290_v28 = vpack.c.b16 %v1289_v25, %v1289_v25  ;;  %v1156_v26 = vpack.c.bf16 %v1119_v27, %v1119_v27  ;;  %v1149_v16 = vpop.f32.mrf.mxu3 }
 0xb75   :  { %v2707_v29 = vpack.c.bf16 %v1149_v16, %v1149_v16  ;;  %v1089_v30 = vpop.f32.mrf.mxu1 }
 0xb76   :  { %v1164_v32 = vsel %vm400_vm0, %v1156_v26, 0  ;;  %v1294_v33 = vunpack.c.l.b16 %v1156_v26  ;;  %v1093_v34 = vmul.f32 0.25, %v1089_v30  ;;  %1291 = vrot.lane.b32.xlu1 %v1290_v28, %s2324_s0 }
 0xb77   :  { %v1254_v31 = vsel %vm497_vm1, %v2707_v29, 0  ;;  %1173 = vmatpush.bf16.xpose.msrb.mxu1 %v1164_v32  ;;  %v1399_v15 = vunpack.c.l.b16 %v2707_v29 }
 0xb78   :  { %v1295_v35 = vpack.c.b16 %v1294_v33, %v1294_v33  ;;  %v1155_v36 = vpack.c.bf16 %v1093_v34, %v1093_v34  ;;  %1263 = vmatpush.bf16.msrb.mxu3 %v1254_v31 }
 0xb79   :  { %v1400_v23 = vpack.c.b16 %v1399_v15, %v1399_v15 }
 0xb7a   :  { %1296 = vrot.lane.b32.xlu0 %v1295_v35, %s2324_s0  ;;  %v1318_v39 = vunpack.c.l.b16 %v1155_v36 }
 0xb7b   :  { %v1121_v37 = vpop.f32.mrf.mxu2 }
 0xb7c   :  { %v1157_v40 = vpack.c.bf16 %v1121_v37, %v1121_v37  ;;  %v1151_v42 = vpop.f32.mrf.mxu3  ;;  %v1319_v47 = vpack.c.b16 %v1318_v39, %v1318_v39 }
 0xb7d   :  { %v2714_v43 = vpack.c.bf16 %v1151_v42, %v1151_v42 }
 0xb7e   :  { %v1183_v44 = vsel %vm400_vm0, %v1157_v40, 0  ;;  %v1323_v45 = vunpack.c.l.b16 %v1157_v40  ;;  %2009 = vmatmul.msk.bf16.vlgmr.msrb.gmra.mxu1 %vm400_vm0, %v1154_v20 }
 0xb7f   :  { %v1273_v46 = vsel %vm497_vm1, %v2714_v43, 0  ;;  %1192 = vmatpush.bf16.xpose.msrb.mxu2 %v1183_v44 }
 0xb80   :  { %v1324_v48 = vpack.c.b16 %v1323_v45, %v1323_v45  ;;  %1282 = vmatpush.bf16.msrb.mxu0 %v1273_v46 }
 0xb82   :  { %1325 = vrot.lane.b32.xlu2 %v1324_v48, %s2324_s0  ;;  %1320 = vrot.lane.b32.xlu0 %v1319_v47, %s2324_s0  ;;  %v1423_v48 = vunpack.c.l.b16 %v2714_v43 }
 0xb86   :  { %2010 = vmatmul.msk.bf16.vlgmr.msrb.gmra.mxu2 %vm400_vm0, %v1155_v36 }
 0xbdc   :  { %v1326_v49 = vpop.permute.xlu2 %1325 }
 0xbdd   :  { %v1331_v50 = vsel %vm400_vm0, %v1326_v49, 0 }
 0xbde   :  { %1340 = vmatpush.bf16.xpose.msra.mxu2 %v1331_v50 }
 0xbe8   :  { %v1292_v41 = vpop.permute.xlu1 %1291 }
 0xbec   :  { %v1297_v51 = vpop.permute.xlu0 %1296 }
 0xbed   :  { %v1302_v52 = vsel %vm400_vm0, %v1297_v51, 0 }
 0xbee   :  { %1311 = vmatpush.bf16.xpose.msra.mxu1 %v1302_v52  ;;  %v1424_v52 = vpack.c.b16 %v1423_v48, %v1423_v48 }
 0xbf4   :  { %v1321_v53 = vpop.permute.xlu0 %1320 }
 0xbf5   :  { %2013 = vmatmul.msk.bf16.vlgmr.msra.gmra.mxu1 %vm400_vm0, %v1292_v41  ;;  %2014 = vmatmul.msk.bf16.vlgmr.msra.gmra.mxu2 %vm400_vm0, %v1321_v53 }
 0xbfb   :  { %v1175_v54 = vpop.f32.mrf.mxu1 }
 0xbfc   :  { %v1198_v55 = vsel %vm2579_vm3, -1e+30, %v1175_v54 }
 0xbfd   :  { %v1200_v56 = vsel %vm443_vm4, %v1198_v55, -inf }
 0xbfe   :  { %1201 = vmax.xlane.f32.xlu2 %v1200_v56 }
 0xc03   :  { %v1177_v57 = vpop.f32.mrf.mxu1 }
 0xc09   :  { %v1194_v58 = vpop.f32.mrf.mxu2 }
 0xc0a   :  { %v1199_v59 = vsel %vm2579_vm3, -1e+30, %v1194_v58 }
 0xc0b   :  { %v1203_v61 = vsel %vm443_vm4, %v1199_v59, -inf }
 0xc0c   :  { %1204 = vmax.xlane.f32.xlu0 %v1203_v61 }
 0xc11   :  { %v1196_v62 = vpop.f32.mrf.mxu2 }
 0xc71   :  { %v1202_v63 = vpop.xlane.xlu2 %1201 }
 0xc72   :  { %v1206_v0 = vsub.f32 %v1198_v55, %v1202_v63  ;;  %v1313_v1 = vpop.f32.mrf.mxu1 }
 0xc73   :  { %v1346_v2 = vsel %vm2579_vm3, -1e+30, %v1313_v1 }
 0xc74   :  { %v1208_v3 = vmul.f32 1.442695, %v1206_v0  ;;  %v1348_v5 = vsel %vm443_vm4, %v1346_v2, -inf }
 0xc75   :  { %1349 = vmax.xlane.f32.xlu1 %v1348_v5 }
 0xc76   :  { %2227 = vpow2.f32 %v1208_v3 }
 0xc78   :  { %v1342_v6 = vpop.f32.mrf.mxu2 }
 0xc79   :  { %v1347_v7 = vsel %vm2579_vm3, -1e+30, %v1342_v6 }
 0xc7a   :  { %v1315_v9 = vpop.f32.mrf.mxu1  ;;  %v1351_v10 = vsel %vm443_vm4, %v1347_v7, -inf }
 0xc7b   :  { %1352 = vmax.xlane.f32.xlu2 %v1351_v10 }
 0xc7c   :  { %v2228_v21 = vpop.eup %2227 }
 0xc7d   :  { %v1212_v12 = vsel %vm443_vm4, %v2228_v21, 0.0 }
 0xc7e   :  { %1213 = vadd.xlane.f32.xlu0 %v1212_v12 }
 0xc7f   :  { %v1205_v13 = vpop.xlane.xlu0 %1204 }
 0xc80   :  { %v1207_v19 = vsub.f32 %v1199_v59, %v1205_v13  ;;  %v1344_v14 = vpop.f32.mrf.mxu2 }
 0xc82   :  { %v1210_v17 = vmul.f32 1.442695, %v1207_v19 }
 0xc84   :  { %2229 = vpow2.f32 %v1210_v17 }
 0xc8a   :  { %v2230_v18 = vpop.eup %2229 }
 0xc8b   :  { %v1215_v22 = vsel %vm443_vm4, %v2230_v18, 0.0 }
 0xc8c   :  { %1216 = vadd.xlane.f32.xlu1 %v1215_v22 }
 0xca5   :  { %1401 = vrot.lane.b32.xlu1 %v1400_v23, %s2324_s0 }
 0xce8   :  { %v1350_v24 = vpop.xlane.xlu1 %1349 }
 0xce9   :  { %v1354_v11 = vsub.f32 %v1346_v2, %v1350_v24 }
 0xceb   :  { %v1356_v60 = vmul.f32 1.442695, %v1354_v11 }
 0xced   :  { %2231 = vpow2.f32 %v1356_v60 }
 0xcee   :  { %v1353_v20 = vpop.xlane.xlu2 %1352 }
 0xcef   :  { %v1355_v25 = vsub.f32 %v1347_v7, %v1353_v20 }
 0xcf1   :  { %v1358_v27 = vmul.f32 1.442695, %v1355_v25  ;;  %v1214_v28 = vpop.xlane.xlu0 %1213 }
 0xcf2   :  { %2233 = vrcp.f32 %v1214_v28  ;;  %v1229_v31 = vand.u32 2147483648, %v1214_v28  ;;  %v1227_v36 = vand.u32 2147483647, %v1214_v28  ;;  %vm1223_vm12 = vweird.f32 %v1214_v28 }
 0xcf3   :  { %v2743_v26 = vpop.eup %2231  ;;  %2235 = vpow2.f32 %v1358_v27 }
 0xcf4   :  { %v1360_v16 = vsel %vm443_vm4, %v2743_v26, 0.0  ;;  %v1230_v40 = vor.u32 1.1754944e-38, %v1229_v31  ;;  %vm1228_vm14 = vcmp.eq.f32.partialorder %v1227_v36, 8.507059e+37 }
 0xcf5   :  { %1361 = vadd.xlane.f32.xlu2 %v1360_v16 }
 0xcf8   :  { %v2234_v29 = vpop.eup %2233 }
 0xcf9   :  { %v2747_v30 = vpop.eup %2235  ;;  %v1219_v32 = vmul.f32 %v2234_v29, %v1214_v28  ;;  %vm1224_vm3 = vweird.f32 %v2234_v29 }
 0xcfa   :  { %v1363_v33 = vsel %vm443_vm4, %v2747_v30, 0.0  ;;  %vm1225_vm13 = vmor %vm1223_vm12, %vm1224_vm3 }
 0xcfb   :  { %v1220_v34 = vsub.f32 1.0, %v1219_v32  ;;  %1364 = vadd.xlane.f32.xlu0 %v1363_v33  ;;  %v2103_v33 = vld [vmem:[%s2870_s8 + $0x8] sm:$0xff] }
 0xcfc   :  { %1486 = vmatpush.bf16.msrb.mxu1 %v2103_v33 }
 0xcfd   :  { %v1221_v35 = vmul.f32 %v2234_v29, %v1220_v34 }
 0xcff   :  { %v1222_v37 = vadd.f32 %v2234_v29, %v1221_v35  ;;  %v1217_v39 = vpop.xlane.xlu1 %1216 }
 0xd00   :  { %2237 = vrcp.f32 %v1217_v39  ;;  %v1244_v51 = vand.u32 2147483648, %v1217_v39  ;;  %v1242_v53 = vand.u32 2147483647, %v1217_v39  ;;  %vm1238_vm5 = vweird.f32 %v1217_v39 }
 0xd01   :  { %v1226_v42 = vsel %vm1225_vm13, %v2234_v29, %v1222_v37 }
 0xd02   :  { %v1231_v44 = vsel %vm1228_vm14, %v1230_v40, %v1226_v42  ;;  %v1245_v55 = vor.u32 1.1754944e-38, %v1244_v51  ;;  %vm1243_vm7 = vcmp.eq.f32.partialorder %v1242_v53, 8.507059e+37 }
 0xd03   :  { %v1232_v45 = vmul.f32 %v2228_v21, %v1231_v44 }
 0xd05   :  { %v1248_v46 = vpack.c.bf16 %v1232_v45, %v1232_v45 }
 0xd06   :  { %v2238_v47 = vpop.eup %2237 }
 0xd07   :  { %v1234_v49 = vmul.f32 %v2238_v47, %v1217_v39  ;;  %2011 = vmatmul.msk.bf16.vlgmr.msrb.gmra.mxu3 %vm443_vm4, %v1248_v46  ;;  %vm1239_vm15 = vweird.f32 %v2238_v47  ;;  %v2102_v39 = vld [vmem:[%s2870_s8] sm:$0xff] }
 0xd08   :  { %vm1240_vm6 = vmor %vm1238_vm5, %vm1239_vm15  ;;  %1487 = vmatpush.bf16.msrb.mxu1 %v2102_v39 }
 0xd09   :  { %v1235_v50 = vsub.f32 1.0, %v1234_v49 }
 0xd0b   :  { %v1236_v41 = vmul.f32 %v2238_v47, %v1235_v50 }
 0xd0d   :  { %v1237_v54 = vadd.f32 %v2238_v47, %v1236_v41  ;;  %1425 = vrot.lane.b32.xlu2 %v1424_v52, %s2324_s0 }
 0xd0f   :  { %v1241_v56 = vsel %vm1240_vm6, %v2238_v47, %v1237_v54  ;;  %v2174_v47 = vld [vmem:[%s2871_s14] ss:$0 sm:$0xff] }
 0xd10   :  { %v1246_v57 = vsel %vm1243_vm7, %v1245_v55, %v1241_v56 }
 0xd11   :  { %v1247_v58 = vmul.f32 %v2230_v18, %v1246_v57 }
 0xd13   :  { %v1249_v43 = vpack.c.bf16 %v1247_v58, %v1247_v58 }
 0xd15   :  { %2012 = vmatmul.msk.bf16.vlgmr.msrb.gmra.mxu0 %vm443_vm4, %v1249_v43 }
 0xd17   :  { %v1402_v59 = vpop.permute.xlu1 %1401 }
 0xd18   :  { %v1407_v61 = vsel %vm497_vm1, %v1402_v59, 0 }
 0xd19   :  { %1416 = vmatpush.bf16.msra.mxu3 %v1407_v61 }
 0xd68   :  { %v1362_v62 = vpop.xlane.xlu2 %1361 }
 0xd69   :  { %2239 = vrcp.f32 %v1362_v62  ;;  %v1377_v6 = vand.u32 2147483648, %v1362_v62  ;;  %v1375_v9 = vand.u32 2147483647, %v1362_v62  ;;  %vm1371_vm9 = vweird.f32 %v1362_v62 }
 0xd6b   :  { %v1378_v13 = vor.u32 1.1754944e-38, %v1377_v6  ;;  %vm1376_vm11 = vcmp.eq.f32.partialorder %v1375_v9, 8.507059e+37 }
 0xd6e   :  { %v1365_v63 = vpop.xlane.xlu0 %1364 }
 0xd6f   :  { %v2240_v0 = vpop.eup %2239  ;;  %2241 = vrcp.f32 %v1365_v63  ;;  %v1392_v18 = vand.u32 2147483648, %v1365_v63  ;;  %v1390_v23 = vand.u32 2147483647, %v1365_v63  ;;  %vm1386_vm3 = vweird.f32 %v1365_v63 }
 0xd70   :  { %v1367_v1 = vmul.f32 %v2240_v0, %v1362_v62  ;;  %v1426_v2 = vpop.permute.xlu2 %1425  ;;  %vm1372_vm8 = vweird.f32 %v2240_v0 }
 0xd71   :  { %v1431_v3 = vsel %vm497_vm1, %v1426_v2, 0  ;;  %vm1373_vm10 = vmor %vm1371_vm9, %vm1372_vm8  ;;  %v1393_v60 = vor.u32 1.1754944e-38, %v1392_v18  ;;  %vm1391_vm13 = vcmp.eq.f32.partialorder %v1390_v23, 8.507059e+37 }
 0xd72   :  { %v1368_v5 = vsub.f32 1.0, %v1367_v1  ;;  %1440 = vmatpush.bf16.msra.mxu0 %v1431_v3  ;;  %v2105_v1 = vld [vmem:[%s2872_s19 + $0x8] sm:$0xff]  ;;  %v2104_v3 = vld [vmem:[%s2872_s19] sm:$0xff] }
 0xd73   :  { %1614 = vmatpush.bf16.msrb.mxu2 %v2105_v1  ;;  %v2107_v1 = vld [vmem:[%s2875_s12 + $0x8] sm:$0xff] }
 0xd74   :  { %v1369_v7 = vmul.f32 %v2240_v0, %v1368_v5 }
 0xd75   :  { %v2242_v10 = vpop.eup %2241 }
 0xd76   :  { %v1370_v21 = vadd.f32 %v2240_v0, %v1369_v7  ;;  %v1382_v12 = vmul.f32 %v2242_v10, %v1365_v63  ;;  %vm1387_vm1 = vweird.f32 %v2242_v10 }
 0xd77   :  { %vm1388_vm12 = vmor %vm1386_vm3, %vm1387_vm1  ;;  %1615 = vmatpush.bf16.msrb.mxu2 %v2104_v3  ;;  %v2177_v3 = vld [vmem:[%s2876_s28] ss:$0 sm:$0xff] }
 0xd78   :  { %v1374_v19 = vsel %vm1373_vm10, %v2240_v0, %v1370_v21  ;;  %v1383_v14 = vsub.f32 1.0, %v1382_v12 }
 0xd79   :  { %v1379_v17 = vsel %vm1376_vm11, %v1378_v13, %v1374_v19 }
 0xd7a   :  { %v1380_v22 = vmul.f32 %v2743_v26, %v1379_v17  ;;  %v1384_v15 = vmul.f32 %v2242_v10, %v1383_v14 }
 0xd7c   :  { %v1385_v24 = vadd.f32 %v2242_v10, %v1384_v15  ;;  %v1396_v11 = vpack.c.bf16 %v1380_v22, %v1380_v22 }
 0xd7e   :  { %v1389_v20 = vsel %vm1388_vm12, %v2242_v10, %v1385_v24  ;;  %2015 = vmatmul.msk.bf16.vlgmr.msra.gmra.mxu3 %vm443_vm4, %v1396_v11 }
 0xd7f   :  { %v1394_v25 = vsel %vm1391_vm13, %v1393_v60, %v1389_v20 }
 0xd80   :  { %v1395_v27 = vmul.f32 %v2747_v30, %v1394_v25 }
 0xd82   :  { %v1397_v28 = vpack.c.bf16 %v1395_v27, %v1395_v27 }
 0xd84   :  { %2016 = vmatmul.msk.bf16.vlgmr.msra.gmra.mxu0 %vm443_vm4, %v1397_v28 }
 0xd8a   :  { %v1265_v26 = vpop.f32.mrf.mxu3 }
 0xd92   :  { %v1267_v16 = vpop.f32.mrf.mxu3  ;;  %v1284_v29 = vpop.f32.mrf.mxu0 }
 0xd9a   :  { %v1286_v32 = vpop.f32.mrf.mxu0 }
 0xe01   :  { %v1418_v34 = vpop.f32.mrf.mxu3  ;;  %v1442_v31 = vpop.f32.mrf.mxu0 }
 0xe02   :  { %v2160_v35 = vpack.i.bf16 %v1442_v31, %v1418_v34 }
 0xe04   :  { %2161 = vrot.lane.b32.xlu0 %v2160_v35, %s2325_s5 }
 0xe09   :  { %v1420_v36 = vpop.f32.mrf.mxu3  ;;  %v1444_v37 = vpop.f32.mrf.mxu0 }
 0xe76   :  { %v2162_v30 = vpop.permute.xlu0 %2161 }
 0xe77   :  { %v2164_v40 = vunpack.i.h.bf16 %v2162_v30  ;;  %v2163_v42 = vunpack.i.l.bf16 %v2162_v30 }
 0xe79   :  { %v1455_v44 = vsel %vm400_vm0, %v1284_v29, %v2164_v40  ;;  %v1454_v45 = vsel %vm400_vm0, %v1265_v26, %v2163_v42 }
 0xe7a   :  { %v1460_v46 = vpack.c.bf16 %v1455_v44, %v1454_v45 }
 0xe7c   :  { %2025 = vmatmul.msk.bf16.vlgmr.msrb.gmra.mxu1 %vm204_vm2, %v1460_v46 }
 0xef9   :  { %v1489_v48 = vpop.f32.mrf.mxu1 }
 0xefa   :  { %v1490_v49 = vadd.f32 %v2174_v47, %v1489_v48 }
 0xefc   :  { %v2769_v50 = vadd.f32 %v1490_v49, %v2669_v4  ;;  %v2175_v49 = vld [vmem:[%s2873_s24] ss:$0 sm:$0xff] }
 0xefe   :  { %v1498_v51 = vsel %vm204_vm2, %v2769_v50, 0.0 }
 0xeff   :  { %1499 = vadd.xlane.f32.xlu0 %v1498_v51 }
 0xf01   :  { %v1491_v52 = vpop.f32.mrf.mxu1 }
 0xf02   :  { %v1492_v41 = vadd.f32 %v2174_v47, %v1491_v52 }
 0xf04   :  { %v2774_v53 = vadd.f32 %v1492_v41, %v2674_v8 }
 0xf06   :  { %v1501_v54 = vsel %vm204_vm2, %v2774_v53, 0.0 }
 0xf07   :  { %1502 = vadd.xlane.f32.xlu1 %v1501_v54 }
 0xf72   :  { %v1500_v55 = vpop.xlane.xlu0 %1499 }
 0xf73   :  { %v1504_v56 = vmul.f32 %v1500_v55, %v2532_v38 }
 0xf75   :  { %v2780_v4 = vsub.f32 %v2769_v50, %v1504_v56  ;;  %v2176_v56 = vld [vmem:[%s2874_s30] ss:$0 sm:$0xff] }
 0xf77   :  { %v1508_v57 = vmul.f32 %v2780_v4, %v2780_v4 }
 0xf79   :  { %v1510_v58 = vsel %vm204_vm2, %v1508_v57, 0.0 }
 0xf7a   :  { %v1503_v43 = vpop.xlane.xlu1 %1502  ;;  %1511 = vadd.xlane.f32.xlu2 %v1510_v58 }
 0xf7b   :  { %v1505_v8 = vmul.f32 %v1503_v43, %v2532_v38 }
 0xf7d   :  { %v2787_v59 = vsub.f32 %v2774_v53, %v1505_v8  ;;  %v2113_v8 = vld [vmem:[%s2875_s12 + $0x38] sm:$0xff] }
 0xf7e   :  { %1709 = vmatpush.bf16.msrb.mxu3 %v2113_v8 }
 0xf7f   :  { %v1509_v61 = vmul.f32 %v2787_v59, %v2787_v59 }
 0xf81   :  { %v1513_v62 = vsel %vm204_vm2, %v1509_v61, 0.0  ;;  %v2112_v61 = vld [vmem:[%s2875_s12 + $0x30] sm:$0xff] }
 0xf82   :  { %1514 = vadd.xlane.f32.xlu0 %v1513_v62  ;;  %1710 = vmatpush.bf16.msrb.mxu3 %v2112_v61  ;;  %v2111_v62 = vld [vmem:[%s2875_s12 + $0x28] sm:$0xff] }
 0xf86   :  { %1711 = vmatpush.bf16.msrb.mxu3 %v2111_v62 }
 0xfed   :  { %v1512_v63 = vpop.xlane.xlu2 %1511 }
 0xfee   :  { %v1516_v0 = vmul.f32 %v1512_v63, %v2532_v38  ;;  %v2109_v63 = vld [vmem:[%s2875_s12 + $0x18] sm:$0xff] }
 0xff0   :  { %v1518_v2 = vadd.f32 1e-05, %v1516_v0  ;;  %v2108_v0 = vld [vmem:[%s2875_s12 + $0x10] sm:$0xff] }
 0xff2   :  { %2243 = vrsqrt.f32 %v1518_v2  ;;  %vm1527_vm0 = vcmp.eq.f32.partialorder %v1518_v2, inf  ;;  %v1530_v15 = vand.u32 2147483648, %v1518_v2  ;;  %vm1529_vm4 = vcmp.eq.f32.partialorder %v1518_v2, 0.0 }
 0xff5   :  { %v1515_v5 = vpop.xlane.xlu0 %1514 }
 0xff6   :  { %v1517_v6 = vmul.f32 %v1515_v5, %v2532_v38 }
 0xff8   :  { %v2244_v7 = vpop.eup %2243  ;;  %v1519_v9 = vadd.f32 1e-05, %v1517_v6 }
 0xff9   :  { %v1521_v10 = vmul.f32 %v2244_v7, %v1518_v2 }
 0xffa   :  { %2245 = vrsqrt.f32 %v1519_v9  ;;  %vm1539_vm14 = vcmp.eq.f32.partialorder %v1519_v9, inf  ;;  %v1542_v27 = vand.u32 2147483648, %v1519_v9  ;;  %vm1541_vm15 = vcmp.eq.f32.partialorder %v1519_v9, 0.0 }
 0xffb   :  { %v1522_v21 = vmul.f32 %v2244_v7, %v1521_v10 }
 0xffd   :  { %v1523_v12 = vmul.f32 0.5, %v1522_v21 }
 0xfff   :  { %v1524_v13 = vsub.f32 1.5, %v1523_v12 }
0x1000   :  { %v2246_v19 = vpop.eup %2245 }
0x1001   :  { %v1525_v14 = vmul.f32 %v2244_v7, %v1524_v13  ;;  %v1533_v17 = vmul.f32 %v2246_v19, %v1519_v9 }
0x1003   :  { %v1526_v18 = vmul.f32 %v1525_v14, %v1518_v2  ;;  %v1534_v22 = vmul.f32 %v2246_v19, %v1533_v17 }
0x1005   :  { %v1528_v23 = vsel %vm1527_vm0, %v1518_v2, %v1526_v18  ;;  %v1535_v24 = vmul.f32 0.5, %v1534_v22  ;;  %v2106_v2 = vld [vmem:[%s2875_s12] sm:$0xff] }
0x1006   :  { %v1531_v11 = vsel %vm1529_vm4, %v1530_v15, %v1528_v23 }
0x1007   :  { %2247 = vrcp.f32 %v1531_v11  ;;  %v1536_v60 = vsub.f32 1.5, %v1535_v24  ;;  %v1555_v34 = vand.u32 2147483648, %v1531_v11  ;;  %vm1549_vm6 = vweird.f32 %v1531_v11 }
0x1008   :  { %v1553_v35 = vand.u32 2147483647, %v1531_v11 }
0x1009   :  { %v1537_v20 = vmul.f32 %v2246_v19, %v1536_v60  ;;  %v1556_v30 = vor.u32 1.1754944e-38, %v1555_v34 }
0x100a   :  { %vm1554_vm8 = vcmp.eq.f32.partialorder %v1553_v35, 8.507059e+37 }
0x100b   :  { %v1538_v25 = vmul.f32 %v1537_v20, %v1519_v9 }
0x100d   :  { %v2248_v28 = vpop.eup %2247  ;;  %v1540_v26 = vsel %vm1539_vm14, %v1519_v9, %v1538_v25 }
0x100e   :  { %v1543_v16 = vsel %vm1541_vm15, %v1542_v27, %v1540_v26  ;;  %v1545_v29 = vmul.f32 %v2248_v28, %v1531_v11  ;;  %vm1550_vm5 = vweird.f32 %v2248_v28 }
0x100f   :  { %2249 = vrcp.f32 %v1543_v16  ;;  %vm1551_vm7 = vmor %vm1549_vm6, %vm1550_vm5  ;;  %v1570_v44 = vand.u32 2147483648, %v1543_v16  ;;  %v1568_v46 = vand.u32 2147483647, %v1543_v16  ;;  %vm1564_vm10 = vweird.f32 %v1543_v16 }
0x1010   :  { %v1546_v32 = vsub.f32 1.0, %v1545_v29 }
0x1011   :  { %v1571_v51 = vor.u32 1.1754944e-38, %v1570_v44  ;;  %vm1569_vm1 = vcmp.eq.f32.partialorder %v1568_v46, 8.507059e+37 }
0x1012   :  { %v1547_v33 = vmul.f32 %v2248_v28, %v1546_v32 }
0x1014   :  { %v1548_v31 = vadd.f32 %v2248_v28, %v1547_v33 }
0x1015   :  { %v2250_v36 = vpop.eup %2249 }
0x1016   :  { %v1552_v37 = vsel %vm1551_vm7, %v2248_v28, %v1548_v31  ;;  %v1560_v39 = vmul.f32 %v2250_v36, %v1543_v16  ;;  %vm1565_vm9 = vweird.f32 %v2250_v36  ;;  %v2178_v16 = vld [vmem:[%s2877_s1] ss:$0 sm:$0xff] }
0x1017   :  { %v1557_v42 = vsel %vm1554_vm8, %v1556_v30, %v1552_v37  ;;  %vm1566_vm11 = vmor %vm1564_vm10, %vm1565_vm9 }
0x1018   :  { %v1561_v40 = vsub.f32 1.0, %v1560_v39  ;;  %v1558_v47 = vmul.f32 %v1557_v42, %v2780_v4 }
0x101a   :  { %v1562_v45 = vmul.f32 %v2250_v36, %v1561_v40  ;;  %v1577_v55 = vmul.f32 %v2175_v49, %v1558_v47 }
0x101c   :  { %v1563_v48 = vadd.f32 %v2250_v36, %v1562_v45  ;;  %v1582_v4 = vadd.f32 %v2176_v56, %v1577_v55 }
0x101e   :  { %v1567_v52 = vsel %vm1566_vm11, %v2250_v36, %v1563_v48 }
0x101f   :  { %v1572_v41 = vsel %vm1569_vm1, %v1571_v51, %v1567_v52  ;;  %v2077_v51 = vld [vmem:[%s2492_s20 + $0x8] sm:$0xff] }
0x1020   :  { %v1573_v54 = vmul.f32 %v1572_v41, %v2787_v59  ;;  %v2110_v59 = vld [vmem:[%s2875_s12 + $0x20] sm:$0xff]  ;;  %1833 = vmatpush.bf16.msrb.mxu0 %v2077_v51 }
0x1021   :  { %1712 = vmatpush.bf16.msrb.mxu3 %v2110_v59  ;;  %v2076_v41 = vld [vmem:[%s2492_s20] sm:$0xff]  ;;  %s2326_s20 = smov [#allocation2]  }
0x1022   :  { %v1578_v57 = vmul.f32 %v2175_v49, %v1573_v54 }
0x1024   :  { %v1583_v58 = vadd.f32 %v2176_v56, %v1578_v57  ;;  %1834 = vmatpush.bf16.msrb.mxu0 %v2076_v41 }
0x1025   :  { %1713 = vmatpush.bf16.msrb.mxu3 %v2109_v63 }
0x1026   :  { %v1588_v43 = vpack.c.bf16 %v1583_v58, %v1582_v4 }
0x1028   :  { %2034 = vmatmul.msk.bf16.vlgmr.msrb.gmra.mxu2 %vm204_vm2, %v1588_v43 }
0x1029   :  { %1714 = vmatpush.bf16.msrb.mxu3 %v2108_v0 }
0x102d   :  { %1715 = vmatpush.bf16.msrb.mxu3 %v2107_v1 }
0x1031   :  { %1716 = vmatpush.bf16.msrb.mxu3 %v2106_v2 }
0x10ab   :  { %v1617_v5 = vpop.f32.mrf.mxu2 }
0x10ac   :  { %v1618_v6 = vadd.f32 %v2177_v3, %v1617_v5 }
0x10ae   :  { %v1624_v7 = vmul.f32 %v1618_v6, %v1618_v6  ;;  %v1622_v60 = vmul.f32 0.5, %v1618_v6 }
0x10b0   :  { %v1626_v9 = vmul.f32 %v1624_v7, %v1618_v6 }
0x10b2   :  { %v1628_v10 = vmul.f32 0.044715, %v1626_v9 }
0x10b3   :  { %v1619_v21 = vpop.f32.mrf.mxu2 }
0x10b4   :  { %v1630_v12 = vadd.f32 %v1628_v10, %v1618_v6  ;;  %v1620_v13 = vadd.f32 %v2177_v3, %v1619_v21 }
0x10b6   :  { %v1625_v19 = vmul.f32 %v1620_v13, %v1620_v13  ;;  %v1632_v14 = vmul.f32 0.7978846, %v1630_v12  ;;  %v1623_v20 = vmul.f32 0.5, %v1620_v13 }
0x10b8   :  { %v1627_v17 = vmul.f32 %v1625_v19, %v1620_v13  ;;  %2251 = vtanh.f32 %v1632_v14 }
0x10ba   :  { %v1629_v18 = vmul.f32 0.044715, %v1627_v17 }
0x10bc   :  { %v1631_v22 = vadd.f32 %v1629_v18, %v1620_v13 }
0x10be   :  { %v1633_v15 = vmul.f32 0.7978846, %v1631_v22  ;;  %v2252_v23 = vpop.eup %2251 }
0x10bf   :  { %v1636_v24 = vadd.f32 1.0, %v2252_v23 }
0x10c0   :  { %2253 = vtanh.f32 %v1633_v15 }
0x10c1   :  { %v1638_v27 = vmul.f32 %v1636_v24, %v1622_v60 }
0x10c6   :  { %v2254_v11 = vpop.eup %2253 }
0x10c7   :  { %v1637_v25 = vadd.f32 1.0, %v2254_v11 }
0x10c9   :  { %v1639_v28 = vmul.f32 %v1637_v25, %v1623_v20 }
0x10cb   :  { %v1656_v26 = vpack.c.bf16 %v1639_v28, %v1638_v27 }
0x10cd   :  { %1717 = vmatmul.bf16.vlgmr.msrb.gmra.mxu3 %v1656_v26 }
0x1150   :  { %v1718_v29 = vpop.f32.mrf.mxu3 }
0x1151   :  { %v1719_v32 = vadd.f32 %v2178_v16, %v1718_v29  ;;  %v2179_v29 = vld [vmem:[%s2482_s4] ss:$0 sm:$0xff]  ;;  %s1847_s4 = sshll.u32 %s2326_s20, 4  ;;  %s1848_s4 = int_to_ptr.vmem [resolvable:$true] %s1847_s4 }
0x1153   :  { %v1723_v33 = vadd.f32 %v1719_v32, %v2769_v50 }
0x1155   :  { %v1725_v34 = vsel %vm204_vm2, %v1723_v33, 0.0 }
0x1156   :  { %1726 = vadd.xlane.f32.xlu1 %v1725_v34 }
0x1158   :  { %v1720_v31 = vpop.f32.mrf.mxu3 }
0x1159   :  { %v1721_v35 = vadd.f32 %v2178_v16, %v1720_v31 }
0x115b   :  { %v1724_v36 = vadd.f32 %v1721_v35, %v2774_v53 }
0x115d   :  { %v1728_v37 = vsel %vm204_vm2, %v1724_v36, 0.0 }
0x115e   :  { %1729 = vadd.xlane.f32.xlu2 %v1728_v37 }
0x11c9   :  { %v1727_v39 = vpop.xlane.xlu1 %1726 }
0x11ca   :  { %v1731_v30 = vmul.f32 %v1727_v39, %v2532_v38 }
0x11cc   :  { %v2816_v40 = vsub.f32 %v1723_v33, %v1731_v30 }
0x11ce   :  { %v1735_v50 = vmul.f32 %v2816_v40, %v2816_v40 }
0x11d0   :  { %v1737_v42 = vsel %vm204_vm2, %v1735_v50, 0.0 }
0x11d1   :  { %v1730_v44 = vpop.xlane.xlu2 %1729  ;;  %1738 = vadd.xlane.f32.xlu0 %v1737_v42 }
0x11d2   :  { %v1732_v45 = vmul.f32 %v1730_v44, %v2532_v38 }
0x11d4   :  { %v2822_v53 = vsub.f32 %v1724_v36, %v1732_v45  ;;  %v2180_v36 = vld [vmem:[%s2487_s6] ss:$0 sm:$0xff]  ;;  %s2277_s6 = scalar_lea.hbm %s2276_s7, 16 }
0x11d5   :  { %p2278_p0 = scmp.ne.s32.totalorder %s2276_s7, %s2277_s6  ;;  %p2281_p2 = scmp.lt.s32.totalorder %s2279_s10, %s2277_s6 }
0x11d6   :  { %v1736_v46 = vmul.f32 %v2822_v53, %v2822_v53 }
0x11d7   :  { %p2282_p3 = por %p2281_p2, %p2280_p1 }
0x11d8   :  { %v1740_v47 = vsel %vm204_vm2, %v1736_v46, 0.0 }
0x11d9   :  { %1741 = vadd.xlane.f32.xlu1 %v1740_v47  ;;  %p2283_p4 = pnand %p2282_p3, %p2278_p0 }
0x1244   :  { %v1739_v48 = vpop.xlane.xlu0 %1738 }
0x1245   :  { %v1743_v49 = vmul.f32 %v1739_v48, %v2532_v38 }
0x1247   :  { %v1745_v52 = vadd.f32 1e-05, %v1743_v49 }
0x1249   :  { %2255 = vrsqrt.f32 %v1745_v52  ;;  %vm1754_vm3 = vcmp.eq.f32.partialorder %v1745_v52, inf  ;;  %v1757_v1 = vand.u32 2147483648, %v1745_v52  ;;  %vm1756_vm12 = vcmp.eq.f32.partialorder %v1745_v52, 0.0 }
0x124c   :  { %v1742_v54 = vpop.xlane.xlu1 %1741 }
0x124d   :  { %v1744_v55 = vmul.f32 %v1742_v54, %v2532_v38 }
0x124f   :  { %v2256_v56 = vpop.eup %2255  ;;  %v1746_v57 = vadd.f32 1e-05, %v1744_v55 }
0x1250   :  { %v1748_v4 = vmul.f32 %v2256_v56, %v1745_v52 }
0x1251   :  { %2257 = vrsqrt.f32 %v1746_v57  ;;  %vm1766_vm13 = vcmp.eq.f32.partialorder %v1746_v57, inf  ;;  %v1769_v9 = vand.u32 2147483648, %v1746_v57  ;;  %vm1768_vm0 = vcmp.eq.f32.partialorder %v1746_v57, 0.0 }
0x1252   :  { %v1749_v58 = vmul.f32 %v2256_v56, %v1748_v4 }
0x1254   :  { %v1750_v43 = vmul.f32 0.5, %v1749_v58 }
0x1256   :  { %v1751_v8 = vsub.f32 1.5, %v1750_v43 }
0x1257   :  { %v2258_v61 = vpop.eup %2257 }
0x1258   :  { %v1752_v62 = vmul.f32 %v2256_v56, %v1751_v8  ;;  %v1760_v59 = vmul.f32 %v2258_v61, %v1746_v57 }
0x125a   :  { %v1753_v63 = vmul.f32 %v1752_v62, %v1745_v52  ;;  %v1761_v0 = vmul.f32 %v2258_v61, %v1760_v59 }
0x125c   :  { %v1755_v2 = vsel %vm1754_vm3, %v1745_v52, %v1753_v63  ;;  %v1762_v3 = vmul.f32 0.5, %v1761_v0 }
0x125d   :  { %v1758_v5 = vsel %vm1756_vm12, %v1757_v1, %v1755_v2 }
0x125e   :  { %2259 = vrcp.f32 %v1758_v5  ;;  %v1763_v38 = vsub.f32 1.5, %v1762_v3  ;;  %v1782_v17 = vand.u32 2147483648, %v1758_v5  ;;  %vm1776_vm14 = vweird.f32 %v1758_v5 }
0x125f   :  { %v1780_v22 = vand.u32 2147483647, %v1758_v5 }
0x1260   :  { %v1764_v6 = vmul.f32 %v2258_v61, %v1763_v38  ;;  %v1783_v11 = vor.u32 1.1754944e-38, %v1782_v17 }
0x1261   :  { %vm1781_vm5 = vcmp.eq.f32.partialorder %v1780_v22, 8.507059e+37 }
0x1262   :  { %v1765_v7 = vmul.f32 %v1764_v6, %v1746_v57 }
0x1264   :  { %v2260_v10 = vpop.eup %2259  ;;  %v1767_v21 = vsel %vm1766_vm13, %v1746_v57, %v1765_v7 }
0x1265   :  { %v1770_v12 = vsel %vm1768_vm0, %v1769_v9, %v1767_v21  ;;  %v1772_v13 = vmul.f32 %v2260_v10, %v1758_v5  ;;  %vm1777_vm4 = vweird.f32 %v2260_v10 }
0x1266   :  { %2261 = vrcp.f32 %v1770_v12  ;;  %vm1778_vm15 = vmor %vm1776_vm14, %vm1777_vm4  ;;  %v1797_v25 = vand.u32 2147483648, %v1770_v12  ;;  %v1795_v28 = vand.u32 2147483647, %v1770_v12  ;;  %vm1791_vm7 = vweird.f32 %v1770_v12 }
0x1267   :  { %v1773_v19 = vsub.f32 1.0, %v1772_v13 }
0x1268   :  { %v1798_v32 = vor.u32 1.1754944e-38, %v1797_v25  ;;  %vm1796_vm9 = vcmp.eq.f32.partialorder %v1795_v28, 8.507059e+37 }
0x1269   :  { %v1774_v14 = vmul.f32 %v2260_v10, %v1773_v19 }
0x126b   :  { %v1775_v18 = vadd.f32 %v2260_v10, %v1774_v14 }
0x126c   :  { %v2262_v15 = vpop.eup %2261 }
0x126d   :  { %v1779_v23 = vsel %vm1778_vm15, %v2260_v10, %v1775_v18  ;;  %v1787_v24 = vmul.f32 %v2262_v15, %v1770_v12  ;;  %vm1792_vm6 = vweird.f32 %v2262_v15 }
0x126e   :  { %v1784_v20 = vsel %vm1781_vm5, %v1783_v11, %v1779_v23  ;;  %vm1793_vm8 = vmor %vm1791_vm7, %vm1792_vm6 }
0x126f   :  { %v1788_v60 = vsub.f32 1.0, %v1787_v24  ;;  %v1785_v26 = vmul.f32 %v1784_v20, %v2816_v40 }
0x1271   :  { %v1789_v27 = vmul.f32 %v2262_v15, %v1788_v60  ;;  %v1804_v35 = vmul.f32 %v2179_v29, %v1785_v26 }
0x1273   :  { %v1790_v16 = vadd.f32 %v2262_v15, %v1789_v27  ;;  %v1809_v39 = vadd.f32 %v2180_v36, %v1804_v35 }
0x1275   :  { %v1794_v33 = vsel %vm1793_vm8, %v2262_v15, %v1790_v16 }
0x1276   :  { %v1799_v34 = vsel %vm1796_vm9, %v1798_v32, %v1794_v33 }
0x1277   :  { %v1800_v31 = vmul.f32 %v1799_v34, %v2822_v53 }
0x1279   :  { %v1805_v37 = vmul.f32 %v2179_v29, %v1800_v31 }
0x127b   :  { %v1810_v30 = vadd.f32 %v2180_v36, %v1805_v37 }
0x127d   :  { %v1811_v50 = vpack.c.bf16 %v1810_v30, %v1809_v39 }
0x127f   :  { %2075 = vmatmul.msk.bf16.vlgmr.msrb.gmra.mxu0 %vm204_vm2, %v1811_v50 }
0x12fc   :  { %v1836_v40 = vpop.f32.mrf.mxu0 }
0x12fd   :  { %1841 = vst [vmem:[#allocation2] sm:$0xff] %v1836_v40 }
0x1304   :  { %v1838_v42 = vpop.f32.mrf.mxu0 }
0x1305   :  { %1842 = vst [vmem:[#allocation2 + $0x8] sm:$0xff] %v1838_v42 }
0x1306   :  { %2286 = shalt.err (!%p2283_p4)
}
0x1307   :  { %s2327_s11 = smov 128   ;;  %s2328_s15 = smov 8  }
0x1308   :  { %1855 = dma.vmem_to_hbm [thread:$0]  %s1848_s4, 256, %s1850_s2, [#allocation3], %s2327_s11, %s2327_s11, %s2328_s15  }
0x1309   :  { %2287 = dma.done.wait [#allocation3], 256  }
0x130a   :  { %2288 = vsyncadd [#allocation3], 4294967040 }
0x130b   :  { %1860 = vsyncpa [#allocation3], 1 }

</bundles_post_ra>
